<compile_context>
chip_gen: v5e
topology: v5e:2x2
jax: 0.10.0
libtpu: 0.0.40
codegen_flags: <defaults>
</compile_context>

<pallas_src>
import functools

import jax
import jax.numpy as jnp
from jax.experimental import pallas as pl
from jax.experimental.pallas import tpu as pltpu


def _pick_tm(m):
    # Largest lane tile (multiple of 128) that keeps the grid >= 2 steps.
    for tm in (1024, 512, 256, 128):
        if m >= 2 * tm:
            return tm
    return min(128, m)


# ----------------------------- Pallas kernels ------------------------------ #

def _matmul_kernel(w_ref, a_ref, b_ref, o_ref, *stat_refs, tm, m_total, with_stats):
    # (Cout, K) @ (K, TM) on the MXU, fused bias add; output is lane-dense.
    o = jnp.dot(w_ref[...], a_ref[...], preferred_element_type=jnp.float32) + b_ref[...]
    o_ref[...] = o
    if with_stats:
        sum_ref, sq_ref = stat_refs
        # Mask garbage lanes of a ragged last tile out of the BN statistics.
        col = pl.program_id(0) * tm + jax.lax.broadcasted_iota(jnp.int32, o.shape, 1)
        om = jnp.where(col < m_total, o, 0.0)
        sum_ref[...] = jnp.sum(om, axis=1, keepdims=True)[None]
        sq_ref[...] = jnp.sum(om * om, axis=1, keepdims=True)[None]


def matmul_cm(wmat, a, bias, *, with_stats=False):
    """wmat: (Nout, K) f32; a: (K, M) f32; bias: (Nout,) f32.

    Returns O = wmat @ a + bias[:, None]  (Nout, M); if with_stats, also the
    per-channel sum and sum-of-squares of O (each (Nout,), fused in-kernel).
    """
    n_out, k = wmat.shape
    _, m = a.shape
    tm = _pick_tm(m)
    nt = pl.cdiv(m, tm)

    kern = functools.partial(_matmul_kernel, tm=tm, m_total=m, with_stats=with_stats)

    out_shape = [jax.ShapeDtypeStruct((n_out, m), jnp.float32)]
    out_specs = [pl.BlockSpec((n_out, tm), lambda i: (0, i))]
    if with_stats:
        out_shape += [jax.ShapeDtypeStruct((nt, n_out, 1), jnp.float32)] * 2
        out_specs += [pl.BlockSpec((1, n_out, 1), lambda i: (i, 0, 0))] * 2

    res = pl.pallas_call(
        kern,
        out_shape=tuple(out_shape),
        grid_spec=pltpu.PrefetchScalarGridSpec(
            num_scalar_prefetch=0,
            grid=(nt,),
            in_specs=[
                pl.BlockSpec((n_out, k), lambda i: (0, 0)),   # weights: resident
                pl.BlockSpec((k, tm), lambda i: (0, i)),      # activation tile
                pl.BlockSpec((n_out, 1), lambda i: (0, 0)),   # bias
            ],
            out_specs=tuple(out_specs),
        ),
        compiler_params=pltpu.CompilerParams(dimension_semantics=("parallel",)),
    )(wmat, a, bias.reshape(n_out, 1))

    if with_stats:
        o, s, q = res
        return o, s[:, :, 0].sum(axis=0), q[:, :, 0].sum(axis=0)
    return res[0]


def _bn_relu_kernel(x_ref, scale_ref, shift_ref, o_ref):
    o_ref[...] = jnp.maximum(x_ref[...] * scale_ref[...] + shift_ref[...], 0.0)


def bn_relu_cm(x, scale, shift):
    """x: (C, M); scale/shift: (C,).  y = relu(x * scale + shift)."""
    c, m = x.shape
    tm = _pick_tm(m)
    return pl.pallas_call(
        _bn_relu_kernel,
        out_shape=jax.ShapeDtypeStruct((c, m), jnp.float32),
        grid_spec=pltpu.PrefetchScalarGridSpec(
            num_scalar_prefetch=0,
            grid=(pl.cdiv(m, tm),),
            in_specs=[
                pl.BlockSpec((c, tm), lambda i: (0, i)),
                pl.BlockSpec((c, 1), lambda i: (0, 0)),
                pl.BlockSpec((c, 1), lambda i: (0, 0)),
            ],
            out_specs=pl.BlockSpec((c, tm), lambda i: (0, i)),
        ),
        compiler_params=pltpu.CompilerParams(dimension_semantics=("parallel",)),
    )(x, scale.reshape(c, 1), shift.reshape(c, 1))


# --------------------------- layer building blocks -------------------------- #
# channels-first 5-D layout: (C, N, D, H, W)

def conv_transpose3d_k2s2_cf(x_cf, w, b):
    """x_cf: (Cin, N, D, H, W); w: torch (Cin, Cout, 2, 2, 2); b: (Cout,)."""
    cin, n, d, h, wd = x_cf.shape
    cout = w.shape[1]
    a = x_cf.reshape(cin, n * d * h * wd)
    # row = ((kd*2 + kh)*2 + kw)*Cout + co   <-   W[ci, co, kd, kh, kw]
    wmat = jnp.transpose(w, (2, 3, 4, 1, 0)).reshape(8 * cout, cin)
    bias8 = jnp.tile(b, 8)
    y = matmul_cm(wmat, a, bias8)                          # (8*Cout, M)
    y = y.reshape(2, 2, 2, cout, n, d, h, wd)
    y = jnp.transpose(y, (3, 4, 5, 0, 6, 1, 7, 2))         # interleave the 2x factors
    return y.reshape(cout, n, 2 * d, 2 * h, 2 * wd)


def conv3d_3x3_p1_cf(x_cf, w, b):
    """x_cf: (Cin, N, D, H, W); w: torch (Cout, Cin, 3, 3, 3); b: (Cout,).

    Returns (y_cf, per-channel sum of y, per-channel sum of squares of y).
    """
    cin, n, d, h, wd = x_cf.shape
    cout = w.shape[0]
    xp = jnp.pad(x_cf, ((0, 0), (0, 0), (1, 1), (1, 1), (1, 1)))
    taps = [xp[:, :, kd:kd + d, kh:kh + h, kw:kw + wd]
            for kd in range(3) for kh in range(3) for kw in range(3)]
    # K ordering: channel-major, tap-minor -> matches w.reshape(Cout, Cin*27).
    a = jnp.stack(taps, axis=1).reshape(cin * 27, n * d * h * wd)
    wmat = w.reshape(cout, cin * 27)
    y, s1, s2 = matmul_cm(wmat, a, b, with_stats=True)
    return y.reshape(cout, n, d, h, wd), s1, s2


def _bn_scale_shift(s1, s2, count, gamma, beta, eps=1e-5):
    mean = s1 / count
    var = jnp.maximum(s2 / count - mean * mean, 0.0)   # biased (training-mode) variance
    scale = gamma * jax.lax.rsqrt(var + eps)
    shift = beta - mean * scale
    return scale, shift


def upsample_forward(params, x1, x2):
    """UpSample.forward.  x1: (N, in_ch, D1, H1, W1), x2: (N, mid_ch, D2, H2, W2) NCDHW."""
    x1_cf = jnp.transpose(x1, (1, 0, 2, 3, 4))
    x2_cf = jnp.transpose(x2, (1, 0, 2, 3, 4))

    x1u = conv_transpose3d_k2s2_cf(x1_cf, params["up_w"], params["up_b"])
    dD = x2_cf.shape[2] - x1u.shape[2]
    dH = x2_cf.shape[3] - x1u.shape[3]
    dW = x2_cf.shape[4] - x1u.shape[4]
    x1u = jnp.pad(
        x1u,
        ((0, 0), (0, 0),
         (dD // 2, dD - dD // 2),
         (dH // 2, dH - dH // 2),
         (dW // 2, dW - dW // 2)),
    )
    x = jnp.concatenate([x2_cf, x1u], axis=0)              # torch.cat([x2, x1], dim=1)

    n, d, h, wd = x.shape[1], x.shape[2], x.shape[3], x.shape[4]
    count = n * d * h * wd

    # DoubleConv: conv1 (+ fused BN stats)
    y1, s1, q1 = conv3d_3x3_p1_cf(x, params["w1"], params["b1"])
    sc1, sh1 = _bn_scale_shift(s1, q1, count, params["g1"], params["be1"])
    # Mid-layer BN+ReLU in plain jnp: XLA fuses it into conv2's im2col gather.
    y1_act = jnp.maximum(y1 * sc1[:, None, None, None, None]
                         + sh1[:, None, None, None, None], 0.0)

    # conv2 (+ fused BN stats) -> final BN+ReLU in a lane-dense Pallas kernel.
    y2, s2, q2 = conv3d_3x3_p1_cf(y1_act, params["w2"], params["b2"])
    sc2, sh2 = _bn_scale_shift(s2, q2, count, params["g2"], params["be2"])
    cout = y2.shape[0]
    y = bn_relu_cm(y2.reshape(cout, count), sc2, sh2)
    y = y.reshape(cout, n, d, h, wd)
    return jnp.transpose(y, (1, 0, 2, 3, 4))               # back to NCDHW


# ---------------------------------- main ----------------------------------- #

if __name__ == "__main__":
    in_ch, mid_ch, out_ch = 8, 4, 4
    key = jax.random.PRNGKey(0)
    ks = jax.random.split(key, 12)

    params = {
        # ConvTranspose3d(in_ch, in_ch, k=2, s=2): weight (Cin, Cout, 2, 2, 2)
        "up_w": 0.1 * jax.random.normal(ks[0], (in_ch, in_ch, 2, 2, 2), jnp.float32),
        "up_b": 0.1 * jax.random.normal(ks[1], (in_ch,), jnp.float32),
        # Conv3d(in_ch + mid_ch, mid_ch, 3): weight (Cout, Cin, 3, 3, 3)
        "w1": 0.1 * jax.random.normal(ks[2], (mid_ch, in_ch + mid_ch, 3, 3, 3), jnp.float32),
        "b1": 0.1 * jax.random.normal(ks[3], (mid_ch,), jnp.float32),
        "g1": 1.0 + 0.1 * jax.random.normal(ks[4], (mid_ch,), jnp.float32),
        "be1": 0.1 * jax.random.normal(ks[5], (mid_ch,), jnp.float32),
        # Conv3d(mid_ch, out_ch, 3)
        "w2": 0.1 * jax.random.normal(ks[6], (out_ch, mid_ch, 3, 3, 3), jnp.float32),
        "b2": 0.1 * jax.random.normal(ks[7], (out_ch,), jnp.float32),
        "g2": 1.0 + 0.1 * jax.random.normal(ks[8], (out_ch,), jnp.float32),
        "be2": 0.1 * jax.random.normal(ks[9], (out_ch,), jnp.float32),
    }

    # torch-layout (NCDHW) inputs: x1 (2, in_ch, 4, 4, 4), x2 (2, mid_ch, 8, 8, 8)
    x1 = jax.random.normal(ks[10], (2, in_ch, 4, 4, 4), jnp.float32)
    x2 = jax.random.normal(ks[11], (2, mid_ch, 8, 8, 8), jnp.float32)

    y = jax.jit(upsample_forward)(params, x1, x2)
    jax.block_until_ready(y)

    assert y.shape == (2, out_ch, 8, 8, 8), y.shape
    assert bool(jnp.all(jnp.isfinite(y)))
    assert bool(jnp.all(y >= 0.0))  # last op is ReLU
    print("KERNEL_OK")
</pallas_src>

<mosaic_0001>
module attributes {stable_mosaic.version = 11 : i64} {
  func.func @_matmul_kernel(%arg0: i32, %arg1: memref<64x8xf32, #tpu.memory_space<vmem>>, %arg2: memref<8x128xf32, #tpu.memory_space<vmem>>, %arg3: memref<64x1xf32, #tpu.memory_space<vmem>>, %arg4: memref<64x128xf32, #tpu.memory_space<vmem>>) attributes {dimension_semantics = [#tpu.dimension_semantics<parallel>], iteration_bounds = array<i64: 1>, scalar_prefetch = 0 : i64, scratch_operands = 0 : i64, tpu.core_type = #tpu.core_type<tc>, window_params = [{pipeline_mode = #tpu.pipeline_mode<synchronous>, transform_indices = @transform_0, window_bounds = array<i64: 64, 8>}, {transform_indices = @transform_1, window_bounds = array<i64: 8, 128>}, {pipeline_mode = #tpu.pipeline_mode<synchronous>, transform_indices = @transform_2, window_bounds = array<i64: 64, 1>}, {transform_indices = @transform_3, window_bounds = array<i64: 64, 128>}]} {
    %c0 = arith.constant 0 : index
    %c0_0 = arith.constant 0 : index
    %0 = vector.load %arg1[%c0, %c0_0] : memref<64x8xf32, #tpu.memory_space<vmem>>, vector<64x8xf32>
    %c0_1 = arith.constant 0 : index
    %c0_2 = arith.constant 0 : index
    %1 = vector.load %arg2[%c0_1, %c0_2] : memref<8x128xf32, #tpu.memory_space<vmem>>, vector<8x128xf32>
    %cst = arith.constant dense<0.000000e+00> : vector<64x128xf32>
    %2 = tpu.matmul %0, %1, %cst {dimension_numbers = #tpu.dot_dimension_numbers<[1], [0], [0], [1], [0, 0, 1, 1], [], []>} : vector<64x8xf32>, vector<8x128xf32>, vector<64x128xf32> -> vector<64x128xf32>
    %c0_3 = arith.constant 0 : index
    %c0_4 = arith.constant 0 : index
    %3 = vector.load %arg3[%c0_3, %c0_4] : memref<64x1xf32, #tpu.memory_space<vmem>>, vector<64x1xf32>
    %4 = vector.broadcast %3 : vector<64x1xf32> to vector<64x128xf32>
    %5 = arith.addf %2, %4 : vector<64x128xf32>
    %c0_5 = arith.constant 0 : index
    %c0_6 = arith.constant 0 : index
    %6 = vector.load %arg4[%c0_5, %c0_6] : memref<64x128xf32, #tpu.memory_space<vmem>>, vector<64x128xf32>
    tpu.vector_store %arg4[%c0_5, %c0_6], %5 {strides = array<i32>} : memref<64x128xf32, #tpu.memory_space<vmem>>, vector<64x128xf32>,
    return
  }
  func.func @transform_0(%arg0: i32) -> (i32, i32) {
    %c0_i32 = arith.constant 0 : i32
    %c0_i32_0 = arith.constant 0 : i32
    %c0_i32_1 = arith.constant 0 : i32
    return %c0_i32, %c0_i32_0 : i32, i32
  }
  func.func @transform_1(%arg0: i32) -> (i32, i32) {
    %c0_i32 = arith.constant 0 : i32
    %c0_i32_0 = arith.constant 0 : i32
    return %c0_i32, %arg0 : i32, i32
  }
  func.func @transform_2(%arg0: i32) -> (i32, i32) {
    %c0_i32 = arith.constant 0 : i32
    %c0_i32_0 = arith.constant 0 : i32
    %c0_i32_1 = arith.constant 0 : i32
    return %c0_i32, %c0_i32_0 : i32, i32
  }
  func.func @transform_3(%arg0: i32) -> (i32, i32) {
    %c0_i32 = arith.constant 0 : i32
    %c0_i32_0 = arith.constant 0 : i32
    return %c0_i32, %arg0 : i32, i32
  }
}

module attributes {stable_mosaic.version = 11 : i64} {
  func.func @_matmul_kernel(%arg0: i32, %arg1: memref<4x324xf32, #tpu.memory_space<vmem>>, %arg2: memref<324x512xf32, #tpu.memory_space<vmem>>, %arg3: memref<4x1xf32, #tpu.memory_space<vmem>>, %arg4: memref<4x512xf32, #tpu.memory_space<vmem>>, %arg5: memref<1x4x1xf32, #tpu.memory_space<vmem>>, %arg6: memref<1x4x1xf32, #tpu.memory_space<vmem>>) attributes {dimension_semantics = [#tpu.dimension_semantics<parallel>], iteration_bounds = array<i64: 2>, scalar_prefetch = 0 : i64, scratch_operands = 0 : i64, tpu.core_type = #tpu.core_type<tc>, window_params = [{pipeline_mode = #tpu.pipeline_mode<synchronous>, transform_indices = @transform_0, window_bounds = array<i64: 4, 324>}, {transform_indices = @transform_1, window_bounds = array<i64: 324, 512>}, {pipeline_mode = #tpu.pipeline_mode<synchronous>, transform_indices = @transform_2, window_bounds = array<i64: 4, 1>}, {transform_indices = @transform_3, window_bounds = array<i64: 4, 512>}, {transform_indices = @transform_4, window_bounds = array<i64: 1, 4, 1>}, {transform_indices = @transform_5, window_bounds = array<i64: 1, 4, 1>}]} {
    %c0 = arith.constant 0 : index
    %c0_0 = arith.constant 0 : index
    %0 = vector.load %arg1[%c0, %c0_0] : memref<4x324xf32, #tpu.memory_space<vmem>>, vector<4x324xf32>
    %c0_1 = arith.constant 0 : index
    %c0_2 = arith.constant 0 : index
    %1 = vector.load %arg2[%c0_1, %c0_2] : memref<324x512xf32, #tpu.memory_space<vmem>>, vector<324x512xf32>
    %cst = arith.constant dense<0.000000e+00> : vector<4x512xf32>
    %2 = tpu.matmul %0, %1, %cst {dimension_numbers = #tpu.dot_dimension_numbers<[1], [0], [0], [1], [0, 0, 1, 1], [], []>} : vector<4x324xf32>, vector<324x512xf32>, vector<4x512xf32> -> vector<4x512xf32>
    %c0_3 = arith.constant 0 : index
    %c0_4 = arith.constant 0 : index
    %3 = vector.load %arg3[%c0_3, %c0_4] : memref<4x1xf32, #tpu.memory_space<vmem>>, vector<4x1xf32>
    %4 = vector.broadcast %3 : vector<4x1xf32> to vector<4x512xf32>
    %5 = arith.addf %2, %4 : vector<4x512xf32>
    %c0_5 = arith.constant 0 : index
    %c0_6 = arith.constant 0 : index
    %6 = vector.load %arg4[%c0_5, %c0_6] : memref<4x512xf32, #tpu.memory_space<vmem>>, vector<4x512xf32>
    tpu.vector_store %arg4[%c0_5, %c0_6], %5 {strides = array<i32>} : memref<4x512xf32, #tpu.memory_space<vmem>>, vector<4x512xf32>,
    %c512_i32 = arith.constant 512 : i32
    %7 = arith.muli %arg0, %c512_i32 : i32
    %8 = tpu.iota {dimensions = array<i32: 1>} : vector<4x512xi32>
    %9 = vector.broadcast %7 : i32 to vector<4x512xi32>
    %10 = arith.addi %9, %8 : vector<4x512xi32>
    %c1024_i32 = arith.constant 1024 : i32
    %11 = vector.broadcast %c1024_i32 : i32 to vector<4x512xi32>
    %12 = arith.cmpi slt, %10, %11 : vector<4x512xi32>
    %cst_7 = arith.constant 0.000000e+00 : f32
    %13 = vector.broadcast %cst_7 : f32 to vector<4x512xf32>
    %14 = arith.select %12, %5, %13 : vector<4x512xi1>, vector<4x512xf32>
    %cst_8 = arith.constant dense<0.000000e+00> : vector<4xf32>
    %15 = vector.multi_reduction <add>, %14, %cst_8 [1] : vector<4x512xf32> to vector<4xf32>
    %16 = vector.shape_cast %15 : vector<4xf32> to vector<4x1xf32>
    %17 = vector.shape_cast %16 : vector<4x1xf32> to vector<1x4x1xf32>
    %c0_9 = arith.constant 0 : index
    %c0_10 = arith.constant 0 : index
    %c0_11 = arith.constant 0 : index
    %18 = vector.load %arg5[%c0_9, %c0_10, %c0_11] : memref<1x4x1xf32, #tpu.memory_space<vmem>>, vector<1x4x1xf32>
    tpu.vector_store %arg5[%c0_9, %c0_10, %c0_11], %17 {strides = array<i32>} : memref<1x4x1xf32, #tpu.memory_space<vmem>>, vector<1x4x1xf32>,
    %19 = arith.mulf %14, %14 : vector<4x512xf32>
    %cst_12 = arith.constant dense<0.000000e+00> : vector<4xf32>
    %20 = vector.multi_reduction <add>, %19, %cst_12 [1] : vector<4x512xf32> to vector<4xf32>
    %21 = vector.shape_cast %20 : vector<4xf32> to vector<4x1xf32>
    %22 = vector.shape_cast %21 : vector<4x1xf32> to vector<1x4x1xf32>
    %c0_13 = arith.constant 0 : index
    %c0_14 = arith.constant 0 : index
    %c0_15 = arith.constant 0 : index
    %23 = vector.load %arg6[%c0_13, %c0_14, %c0_15] : memref<1x4x1xf32, #tpu.memory_space<vmem>>, vector<1x4x1xf32>
    tpu.vector_store %arg6[%c0_13, %c0_14, %c0_15], %22 {strides = array<i32>} : memref<1x4x1xf32, #tpu.memory_space<vmem>>, vector<1x4x1xf32>,
    return
  }
  func.func @transform_0(%arg0: i32) -> (i32, i32) {
    %c0_i32 = arith.constant 0 : i32
    %c0_i32_0 = arith.constant 0 : i32
    %c0_i32_1 = arith.constant 0 : i32
    return %c0_i32, %c0_i32_0 : i32, i32
  }
  func.func @transform_1(%arg0: i32) -> (i32, i32) {
    %c0_i32 = arith.constant 0 : i32
    %c0_i32_0 = arith.constant 0 : i32
    return %c0_i32, %arg0 : i32, i32
  }
  func.func @transform_2(%arg0: i32) -> (i32, i32) {
    %c0_i32 = arith.constant 0 : i32
    %c0_i32_0 = arith.constant 0 : i32
    %c0_i32_1 = arith.constant 0 : i32
    return %c0_i32, %c0_i32_0 : i32, i32
  }
  func.func @transform_3(%arg0: i32) -> (i32, i32) {
    %c0_i32 = arith.constant 0 : i32
    %c0_i32_0 = arith.constant 0 : i32
    return %c0_i32, %arg0 : i32, i32
  }
  func.func @transform_4(%arg0: i32) -> (i32, i32, i32) {
    %c0_i32 = arith.constant 0 : i32
    %c0_i32_0 = arith.constant 0 : i32
    %c0_i32_1 = arith.constant 0 : i32
    return %arg0, %c0_i32, %c0_i32_0 : i32, i32, i32
  }
  func.func @transform_5(%arg0: i32) -> (i32, i32, i32) {
    %c0_i32 = arith.constant 0 : i32
    %c0_i32_0 = arith.constant 0 : i32
    %c0_i32_1 = arith.constant 0 : i32
    return %arg0, %c0_i32, %c0_i32_0 : i32, i32, i32
  }
}

module attributes {stable_mosaic.version = 11 : i64} {
  func.func @_matmul_kernel(%arg0: i32, %arg1: memref<4x108xf32, #tpu.memory_space<vmem>>, %arg2: memref<108x512xf32, #tpu.memory_space<vmem>>, %arg3: memref<4x1xf32, #tpu.memory_space<vmem>>, %arg4: memref<4x512xf32, #tpu.memory_space<vmem>>, %arg5: memref<1x4x1xf32, #tpu.memory_space<vmem>>, %arg6: memref<1x4x1xf32, #tpu.memory_space<vmem>>) attributes {dimension_semantics = [#tpu.dimension_semantics<parallel>], iteration_bounds = array<i64: 2>, scalar_prefetch = 0 : i64, scratch_operands = 0 : i64, tpu.core_type = #tpu.core_type<tc>, window_params = [{pipeline_mode = #tpu.pipeline_mode<synchronous>, transform_indices = @transform_0, window_bounds = array<i64: 4, 108>}, {transform_indices = @transform_1, window_bounds = array<i64: 108, 512>}, {pipeline_mode = #tpu.pipeline_mode<synchronous>, transform_indices = @transform_2, window_bounds = array<i64: 4, 1>}, {transform_indices = @transform_3, window_bounds = array<i64: 4, 512>}, {transform_indices = @transform_4, window_bounds = array<i64: 1, 4, 1>}, {transform_indices = @transform_5, window_bounds = array<i64: 1, 4, 1>}]} {
    %c0 = arith.constant 0 : index
    %c0_0 = arith.constant 0 : index
    %0 = vector.load %arg1[%c0, %c0_0] : memref<4x108xf32, #tpu.memory_space<vmem>>, vector<4x108xf32>
    %c0_1 = arith.constant 0 : index
    %c0_2 = arith.constant 0 : index
    %1 = vector.load %arg2[%c0_1, %c0_2] : memref<108x512xf32, #tpu.memory_space<vmem>>, vector<108x512xf32>
    %cst = arith.constant dense<0.000000e+00> : vector<4x512xf32>
    %2 = tpu.matmul %0, %1, %cst {dimension_numbers = #tpu.dot_dimension_numbers<[1], [0], [0], [1], [0, 0, 1, 1], [], []>} : vector<4x108xf32>, vector<108x512xf32>, vector<4x512xf32> -> vector<4x512xf32>
    %c0_3 = arith.constant 0 : index
    %c0_4 = arith.constant 0 : index
    %3 = vector.load %arg3[%c0_3, %c0_4] : memref<4x1xf32, #tpu.memory_space<vmem>>, vector<4x1xf32>
    %4 = vector.broadcast %3 : vector<4x1xf32> to vector<4x512xf32>
    %5 = arith.addf %2, %4 : vector<4x512xf32>
    %c0_5 = arith.constant 0 : index
    %c0_6 = arith.constant 0 : index
    %6 = vector.load %arg4[%c0_5, %c0_6] : memref<4x512xf32, #tpu.memory_space<vmem>>, vector<4x512xf32>
    tpu.vector_store %arg4[%c0_5, %c0_6], %5 {strides = array<i32>} : memref<4x512xf32, #tpu.memory_space<vmem>>, vector<4x512xf32>,
    %c512_i32 = arith.constant 512 : i32
    %7 = arith.muli %arg0, %c512_i32 : i32
    %8 = tpu.iota {dimensions = array<i32: 1>} : vector<4x512xi32>
    %9 = vector.broadcast %7 : i32 to vector<4x512xi32>
    %10 = arith.addi %9, %8 : vector<4x512xi32>
    %c1024_i32 = arith.constant 1024 : i32
    %11 = vector.broadcast %c1024_i32 : i32 to vector<4x512xi32>
    %12 = arith.cmpi slt, %10, %11 : vector<4x512xi32>
    %cst_7 = arith.constant 0.000000e+00 : f32
    %13 = vector.broadcast %cst_7 : f32 to vector<4x512xf32>
    %14 = arith.select %12, %5, %13 : vector<4x512xi1>, vector<4x512xf32>
    %cst_8 = arith.constant dense<0.000000e+00> : vector<4xf32>
    %15 = vector.multi_reduction <add>, %14, %cst_8 [1] : vector<4x512xf32> to vector<4xf32>
    %16 = vector.shape_cast %15 : vector<4xf32> to vector<4x1xf32>
    %17 = vector.shape_cast %16 : vector<4x1xf32> to vector<1x4x1xf32>
    %c0_9 = arith.constant 0 : index
    %c0_10 = arith.constant 0 : index
    %c0_11 = arith.constant 0 : index
    %18 = vector.load %arg5[%c0_9, %c0_10, %c0_11] : memref<1x4x1xf32, #tpu.memory_space<vmem>>, vector<1x4x1xf32>
    tpu.vector_store %arg5[%c0_9, %c0_10, %c0_11], %17 {strides = array<i32>} : memref<1x4x1xf32, #tpu.memory_space<vmem>>, vector<1x4x1xf32>,
    %19 = arith.mulf %14, %14 : vector<4x512xf32>
    %cst_12 = arith.constant dense<0.000000e+00> : vector<4xf32>
    %20 = vector.multi_reduction <add>, %19, %cst_12 [1] : vector<4x512xf32> to vector<4xf32>
    %21 = vector.shape_cast %20 : vector<4xf32> to vector<4x1xf32>
    %22 = vector.shape_cast %21 : vector<4x1xf32> to vector<1x4x1xf32>
    %c0_13 = arith.constant 0 : index
    %c0_14 = arith.constant 0 : index
    %c0_15 = arith.constant 0 : index
    %23 = vector.load %arg6[%c0_13, %c0_14, %c0_15] : memref<1x4x1xf32, #tpu.memory_space<vmem>>, vector<1x4x1xf32>
    tpu.vector_store %arg6[%c0_13, %c0_14, %c0_15], %22 {strides = array<i32>} : memref<1x4x1xf32, #tpu.memory_space<vmem>>, vector<1x4x1xf32>,
    return
  }
  func.func @transform_0(%arg0: i32) -> (i32, i32) {
    %c0_i32 = arith.constant 0 : i32
    %c0_i32_0 = arith.constant 0 : i32
    %c0_i32_1 = arith.constant 0 : i32
    return %c0_i32, %c0_i32_0 : i32, i32
  }
  func.func @transform_1(%arg0: i32) -> (i32, i32) {
    %c0_i32 = arith.constant 0 : i32
    %c0_i32_0 = arith.constant 0 : i32
    return %c0_i32, %arg0 : i32, i32
  }
  func.func @transform_2(%arg0: i32) -> (i32, i32) {
    %c0_i32 = arith.constant 0 : i32
    %c0_i32_0 = arith.constant 0 : i32
    %c0_i32_1 = arith.constant 0 : i32
    return %c0_i32, %c0_i32_0 : i32, i32
  }
  func.func @transform_3(%arg0: i32) -> (i32, i32) {
    %c0_i32 = arith.constant 0 : i32
    %c0_i32_0 = arith.constant 0 : i32
    return %c0_i32, %arg0 : i32, i32
  }
  func.func @transform_4(%arg0: i32) -> (i32, i32, i32) {
    %c0_i32 = arith.constant 0 : i32
    %c0_i32_0 = arith.constant 0 : i32
    %c0_i32_1 = arith.constant 0 : i32
    return %arg0, %c0_i32, %c0_i32_0 : i32, i32, i32
  }
  func.func @transform_5(%arg0: i32) -> (i32, i32, i32) {
    %c0_i32 = arith.constant 0 : i32
    %c0_i32_0 = arith.constant 0 : i32
    %c0_i32_1 = arith.constant 0 : i32
    return %arg0, %c0_i32, %c0_i32_0 : i32, i32, i32
  }
}

module attributes {stable_mosaic.version = 11 : i64} {
  func.func @_bn_relu_kernel(%arg0: i32, %arg1: memref<4x512xf32, #tpu.memory_space<vmem>>, %arg2: memref<4x1xf32, #tpu.memory_space<vmem>>, %arg3: memref<4x1xf32, #tpu.memory_space<vmem>>, %arg4: memref<4x512xf32, #tpu.memory_space<vmem>>) attributes {dimension_semantics = [#tpu.dimension_semantics<parallel>], iteration_bounds = array<i64: 2>, scalar_prefetch = 0 : i64, scratch_operands = 0 : i64, tpu.core_type = #tpu.core_type<tc>, window_params = [{transform_indices = @transform_0, window_bounds = array<i64: 4, 512>}, {pipeline_mode = #tpu.pipeline_mode<synchronous>, transform_indices = @transform_1, window_bounds = array<i64: 4, 1>}, {pipeline_mode = #tpu.pipeline_mode<synchronous>, transform_indices = @transform_2, window_bounds = array<i64: 4, 1>}, {transform_indices = @transform_3, window_bounds = array<i64: 4, 512>}]} {
    %c0 = arith.constant 0 : index
    %c0_0 = arith.constant 0 : index
    %0 = vector.load %arg1[%c0, %c0_0] : memref<4x512xf32, #tpu.memory_space<vmem>>, vector<4x512xf32>
    %c0_1 = arith.constant 0 : index
    %c0_2 = arith.constant 0 : index
    %1 = vector.load %arg2[%c0_1, %c0_2] : memref<4x1xf32, #tpu.memory_space<vmem>>, vector<4x1xf32>
    %2 = vector.broadcast %1 : vector<4x1xf32> to vector<4x512xf32>
    %3 = arith.mulf %0, %2 : vector<4x512xf32>
    %c0_3 = arith.constant 0 : index
    %c0_4 = arith.constant 0 : index
    %4 = vector.load %arg3[%c0_3, %c0_4] : memref<4x1xf32, #tpu.memory_space<vmem>>, vector<4x1xf32>
    %5 = vector.broadcast %4 : vector<4x1xf32> to vector<4x512xf32>
    %6 = arith.addf %3, %5 : vector<4x512xf32>
    %cst = arith.constant 0.000000e+00 : f32
    %7 = vector.broadcast %cst : f32 to vector<4x512xf32>
    %8 = arith.maximumf %6, %7 : vector<4x512xf32>
    %c0_5 = arith.constant 0 : index
    %c0_6 = arith.constant 0 : index
    %9 = vector.load %arg4[%c0_5, %c0_6] : memref<4x512xf32, #tpu.memory_space<vmem>>, vector<4x512xf32>
    tpu.vector_store %arg4[%c0_5, %c0_6], %8 {strides = array<i32>} : memref<4x512xf32, #tpu.memory_space<vmem>>, vector<4x512xf32>,
    return
  }
  func.func @transform_0(%arg0: i32) -> (i32, i32) {
    %c0_i32 = arith.constant 0 : i32
    %c0_i32_0 = arith.constant 0 : i32
    return %c0_i32, %arg0 : i32, i32
  }
  func.func @transform_1(%arg0: i32) -> (i32, i32) {
    %c0_i32 = arith.constant 0 : i32
    %c0_i32_0 = arith.constant 0 : i32
    %c0_i32_1 = arith.constant 0 : i32
    return %c0_i32, %c0_i32_0 : i32, i32
  }
  func.func @transform_2(%arg0: i32) -> (i32, i32) {
    %c0_i32 = arith.constant 0 : i32
    %c0_i32_0 = arith.constant 0 : i32
    %c0_i32_1 = arith.constant 0 : i32
    return %c0_i32, %c0_i32_0 : i32, i32
  }
  func.func @transform_3(%arg0: i32) -> (i32, i32) {
    %c0_i32 = arith.constant 0 : i32
    %c0_i32_0 = arith.constant 0 : i32
    return %c0_i32, %arg0 : i32, i32
  }
}

</mosaic_0001>

<bundles_post_ra>
// kernel: tile.0
= control target key start
LH: loop header
LB: loop body
LE: loop exit
PB: predicated region body
PF: predicated region fallthrough
CT: control target
= control target key end

     0   :  { %vm3_vm0 = vcmask 7168   ;;  %s84_s8 = smov 125   ;;  %s85_s13 = smov 123   ;;  %s167_s0 = inlined_call_operand.vmem [shape: f32[8,8], index: 0, kind: input, shape index: {}]   ;;  %s168_s1 = inlined_call_operand.vmem [shape: f32[64,1], index: 1, kind: output, shape index: {}]  }
   0x1   :  { %v6_v0 = vld [vmem:[%s167_s0] sm:$0xff]   ;;  %s83_s0 = smov 127   ;;  %s86_s14 = smov 126  }
   0x2   :  { %7 = vrot.lane.b32.xlu0 %v6_v0, %s83_s0  ;;  %23 = vrot.lane.b32.xlu1 %v6_v0, %s84_s8  ;;  %4 = vst.msk [vmem:[%s168_s1] ss:$8 sm:$0xf] %vm3_vm0, %v6_v0   ;;  %s87_s15 = smov 124   ;;  %s88_s16 = smov 122  }
   0x3   :  { %5 = vst.msk [vmem:[%s168_s1] ss:$8 sm:$0xf0] %vm3_vm0, %v6_v0   ;;  %39 = vrot.lane.b32.xlu2 %v6_v0, %s85_s13  ;;  %s89_s17 = smov 121  }
   0xa   :  { %15 = vrot.lane.b32.xlu0 %v6_v0, %s86_s14  ;;  %31 = vrot.lane.b32.xlu1 %v6_v0, %s87_s15 }
   0xb   :  { %47 = vrot.lane.b32.xlu2 %v6_v0, %s88_s16 }
  0x12   :  { %55 = vrot.lane.b32.xlu0 %v6_v0, %s89_s17 }
  0x5d   :  { %v40_v1 = vpop.permute.xlu2 %39  }
  0x5e   :  { %70 = vst.msk [vmem:[%s168_s1 + $0x5] ss:$8 sm:$0xf] %vm3_vm0, %v40_v1  }
  0x5f   :  { %71 = vst.msk [vmem:[%s168_s1 + $0x5] ss:$8 sm:$0xf0] %vm3_vm0, %v40_v1  }
  0x65   :  { %v48_v2 = vpop.permute.xlu2 %47  }
  0x66   :  { %72 = vst.msk [vmem:[%s168_s1 + $0x6] ss:$8 sm:$0xf] %vm3_vm0, %v48_v2  }
  0x67   :  { %73 = vst.msk [vmem:[%s168_s1 + $0x6] ss:$8 sm:$0xf0] %vm3_vm0, %v48_v2  }
  0x74   :  { %v8_v3 = vpop.permute.xlu0 %7   ;;  %v24_v4 = vpop.permute.xlu1 %23  }
  0x75   :  { %62 = vst.msk [vmem:[%s168_s1 + $0x1] ss:$8 sm:$0xf] %vm3_vm0, %v8_v3  }
  0x76   :  { %63 = vst.msk [vmem:[%s168_s1 + $0x1] ss:$8 sm:$0xf0] %vm3_vm0, %v8_v3  }
  0x77   :  { %66 = vst.msk [vmem:[%s168_s1 + $0x3] ss:$8 sm:$0xf] %vm3_vm0, %v24_v4  }
  0x78   :  { %67 = vst.msk [vmem:[%s168_s1 + $0x3] ss:$8 sm:$0xf0] %vm3_vm0, %v24_v4  }
  0x7c   :  { %v16_v5 = vpop.permute.xlu0 %15   ;;  %v32_v6 = vpop.permute.xlu1 %31  }
  0x7d   :  { %64 = vst.msk [vmem:[%s168_s1 + $0x2] ss:$8 sm:$0xf] %vm3_vm0, %v16_v5  }
  0x7e   :  { %65 = vst.msk [vmem:[%s168_s1 + $0x2] ss:$8 sm:$0xf0] %vm3_vm0, %v16_v5  }
  0x7f   :  { %68 = vst.msk [vmem:[%s168_s1 + $0x4] ss:$8 sm:$0xf] %vm3_vm0, %v32_v6  }
  0x80   :  { %69 = vst.msk [vmem:[%s168_s1 + $0x4] ss:$8 sm:$0xf0] %vm3_vm0, %v32_v6  }
  0x84   :  { %v56_v7 = vpop.permute.xlu0 %55  }
  0x85   :  { %74 = vst.msk [vmem:[%s168_s1 + $0x7] ss:$8 sm:$0xf] %vm3_vm0, %v56_v7  }
  0x86   :  { %75 = vst.msk [vmem:[%s168_s1 + $0x7] ss:$8 sm:$0xf0] %vm3_vm0, %v56_v7  }

// kernel: tile.8
= control target key start
LH: loop header
LB: loop body
LE: loop exit
PB: predicated region body
PF: predicated region fallthrough
CT: control target
= control target key end

     0   :  { %2 = vsyncpa [#allocation1], 0  ;;  %s48_s8 = smov [#allocation0]   ;;  %s65_s0 = inlined_call_operand.hbm [shape: f32[8], index: 0, kind: input, shape index: {}]   ;;  %s66_s1 = inlined_call_operand.vmem [shape: f32[8,8], index: 1, kind: output, shape index: {}]  }
   0x1   :  { %s8_s0 = sshll.u32 %s65_s0, 4  ;;  %s10_s9 = sshll.u32 %s48_s8, 4  ;;  %s9_s0 = int_to_ptr.hbm [resolvable:$true] %s8_s0  ;;  %s11_s9 = int_to_ptr.vmem [resolvable:$true] %s10_s9 }
   0x2   :  { %13 = dma.hbm_to_vmem [thread:$0]  %s9_s0, 16, %s11_s9, [#allocation1]  }
   0x3   :  { %46 = dma.done.wait [#allocation1], 16  }
   0x4   :  { %47 = vsyncadd [#allocation1], 4294967280  ;;  %v18_v0 = vld [vmem:[#allocation0] ss:$0 sm:$0xff] }
   0x5   :  { %19 = vst [vmem:[%s66_s1] sm:$0xff] %v18_v0 }
   0x6   :  { %20 = vsyncpa [#allocation1], 1 }

// kernel: upsample_forward.4
= control target key start
LH: loop header
LB: loop body
LE: loop exit
PB: predicated region body
PF: predicated region fallthrough
CT: control target
= control target key end

     0   :  { %v164_v0 = vmov 0   ;;  %vm71_vm0 = vcmask 64512   ;;  %s268_s2 = inlined_call_operand.vmem [shape: f32[64,1], index: 2, kind: input, shape index: {}]   ;;  %s269_s1 = inlined_call_operand.vmem [shape: f32[8,128], index: 1, kind: input, shape index: {}]   ;;  %s270_s0 = inlined_call_operand.vmem [shape: f32[64,8], index: 0, kind: input, shape index: {}]   ;;  %s271_s3 = inlined_call_operand.vmem [shape: f32[64,128], index: 3, kind: output, shape index: {}]  }
   0x1   :  { %162 = vset.pattern.permute.xlu1 %v164_v0  ;;  %161 = vset.pattern.permute.xlu0 %v164_v0  ;;  %v25_v1 = vld [vmem:[%s268_s2 + $0x10] sm:$0xff]  ;;  %v23_v2 = vld [vmem:[%s268_s2] sm:$0xff]  ;;  %v26_v9 = vld [vmem:[%s268_s2 + $0x18] sm:$0xff] }
   0x2   :  { %v22_v3 = vld [vmem:[%s269_s1] sm:$0xff]  ;;  %43 = vperm.xlu1 %162, %v25_v1   ;;  %33 = vperm.xlu0 %161, %v23_v2   ;;  %v16_v5 = vld [vmem:[%s270_s0 + $0x10] sm:$0xff]  ;;  %v24_v10 = vld [vmem:[%s268_s2 + $0x8] sm:$0xff] }
   0x3   :  { %v14_v4 = vld [vmem:[%s270_s0] sm:$0xff]  ;;  %111 = vmatpush.msra.mxu0 %v22_v3  ;;  %157 = vmatpush.msra.mxu1 %v22_v3  ;;  %v20_v7 = vld [vmem:[%s270_s0 + $0x30] sm:$0xff]  ;;  %v15_v11 = vld [vmem:[%s270_s0 + $0x8] sm:$0xff] }
   0x4   :  { %v18_v6 = vld [vmem:[%s270_s0 + $0x20] sm:$0xff]  ;;  %158 = vmatpush.msra.mxu2 %v22_v3  ;;  %159 = vmatpush.msra.mxu3 %v22_v3  ;;  %v17_v12 = vld [vmem:[%s270_s0 + $0x18] sm:$0xff]  ;;  %v19_v13 = vld [vmem:[%s270_s0 + $0x28] sm:$0xff] }
   0x5   :  { %149 = vmatmul.msk.f32.vlgmr.msra.gmra.mxu0 %vm71_vm0, %v14_v4  ;;  %151 = vmatmul.msk.f32.vlgmr.msra.gmra.mxu1 %vm71_vm0, %v16_v5  ;;  %v27_v8 = vld [vmem:[%s268_s2 + $0x20] sm:$0xff]  ;;  %v21_v14 = vld [vmem:[%s270_s0 + $0x38] sm:$0xff]  ;;  %v28_v15 = vld [vmem:[%s268_s2 + $0x28] sm:$0xff] }
   0x6   :  { %153 = vmatmul.msk.f32.vlgmr.msra.gmra.mxu2 %vm71_vm0, %v18_v6  ;;  %155 = vmatmul.msk.f32.vlgmr.msra.gmra.mxu3 %vm71_vm0, %v20_v7  ;;  %v30_v16 = vld [vmem:[%s268_s2 + $0x38] sm:$0xff]  ;;  %v29_v17 = vld [vmem:[%s268_s2 + $0x30] sm:$0xff] }
   0x7   :  { %163 = vset.pattern.permute.xlu2 %v164_v0 }
   0x8   :  { %53 = vperm.xlu2 %163, %v27_v8  }
   0xa   :  { %48 = vperm.xlu1 %162, %v26_v9   ;;  %38 = vperm.xlu0 %161, %v24_v10  }
   0xd   :  { %150 = vmatmul.msk.f32.gmra.mxu0 %vm71_vm0, %v15_v11  ;;  %152 = vmatmul.msk.f32.gmra.mxu1 %vm71_vm0, %v17_v12 }
   0xe   :  { %154 = vmatmul.msk.f32.gmra.mxu2 %vm71_vm0, %v19_v13  ;;  %156 = vmatmul.msk.f32.gmra.mxu3 %vm71_vm0, %v21_v14 }
  0x10   :  { %58 = vperm.xlu2 %163, %v28_v15  }
  0x12   :  { %68 = vperm.xlu1 %162, %v30_v16   ;;  %63 = vperm.xlu0 %161, %v29_v17  }
  0x62   :  { %v54_v26 = vpop.permute.xlu2 %53 }
  0x6a   :  { %v59_v37 = vpop.permute.xlu2 %58 }
  0x74   :  { %v34_v18 = vpop.permute.xlu0 %33  ;;  %v44_v19 = vpop.permute.xlu1 %43 }
  0x7c   :  { %v39_v20 = vpop.permute.xlu0 %38  ;;  %v49_v25 = vpop.permute.xlu1 %48 }
  0x82   :  { %v113_v21 = vpop.f32.mrf.mxu0  ;;  %v119_v22 = vpop.f32.mrf.mxu1 }
  0x83   :  { %v114_v23 = vadd.f32 %v113_v21, %v34_v18  ;;  %v120_v24 = vadd.f32 %v119_v22, %v44_v19 }
  0x84   :  { %v64_v27 = vpop.permute.xlu0 %63  ;;  %v69_v36 = vpop.permute.xlu1 %68 }
  0x85   :  { %137 = vst [vmem:[%s271_s3] sm:$0xff] %v114_v23 }
  0x86   :  { %139 = vst [vmem:[%s271_s3 + $0x10] sm:$0xff] %v120_v24 }
  0x89   :  { %v125_v28 = vpop.f32.mrf.mxu2  ;;  %v131_v29 = vpop.f32.mrf.mxu3 }
  0x8a   :  { %v126_v30 = vadd.f32 %v125_v28, %v54_v26  ;;  %v132_v31 = vadd.f32 %v131_v29, %v64_v27  ;;  %v116_v32 = vpop.f32.mrf.mxu0  ;;  %v122_v33 = vpop.f32.mrf.mxu1 }
  0x8b   :  { %v117_v34 = vadd.f32 %v116_v32, %v39_v20  ;;  %v123_v35 = vadd.f32 %v122_v33, %v49_v25 }
  0x8c   :  { %141 = vst [vmem:[%s271_s3 + $0x20] sm:$0xff] %v126_v30 }
  0x8d   :  { %143 = vst [vmem:[%s271_s3 + $0x30] sm:$0xff] %v132_v31 }
  0x8e   :  { %138 = vst [vmem:[%s271_s3 + $0x8] sm:$0xff] %v117_v34 }
  0x8f   :  { %140 = vst [vmem:[%s271_s3 + $0x18] sm:$0xff] %v123_v35 }
  0x91   :  { %v128_v38 = vpop.f32.mrf.mxu2  ;;  %v134_v39 = vpop.f32.mrf.mxu3 }
  0x92   :  { %v129_v40 = vadd.f32 %v128_v38, %v59_v37  ;;  %v135_v41 = vadd.f32 %v134_v39, %v69_v36 }
  0x94   :  { %142 = vst [vmem:[%s271_s3 + $0x28] sm:$0xff] %v129_v40 }
  0x95   :  { %144 = vst [vmem:[%s271_s3 + $0x38] sm:$0xff] %v135_v41 }

// kernel: upsample_forward.5
= control target key start
LH: loop header
LB: loop body
LE: loop exit
PB: predicated region body
PF: predicated region fallthrough
CT: control target
= control target key end

     0   :  { %s1318_s18 = smov 0   ;;  %s1320_s19 = smov 0   ;;  %s1927_s0 = inlined_call_operand.vmem [shape: f32[4,324], index: 0, kind: input, shape index: {}]   ;;  %s1928_s1 = inlined_call_operand.vmem [shape: f32[324,1024], index: 1, kind: input, shape index: {}]   ;;  %s1929_s2 = inlined_call_operand.vmem [shape: f32[4,1], index: 2, kind: input, shape index: {}]   ;;  %s1930_s3 = inlined_call_operand.vmem [shape: f32[4,1024], index: 3, kind: output, shape index: {0}]   ;;  %s1931_s4 = inlined_call_operand.vmem [shape: f32[2,4,1], index: 4, kind: output, shape index: {1}]   ;;  %s1932_s5 = inlined_call_operand.vmem [shape: f32[2,4,1], index: 5, kind: output, shape index: {2}]  }
   0x1   :  { %s1322_s20 = smov 0  }
   0x2 LB: > { %s1334_s21 = sadd.s32 4294967295, %s1285_s20   ;;  %s1337_s22 = sadd.s32 1, %s1285_s20   ;;  %s1285_s20 = sphi %s1322_s20, %s1935_s20   ;;  %s1281_s19 = sphi %s1320_s19, %s1934_s19   ;;  %s1277_s18 = sphi %s1318_s18, %s1933_s18  }
   0x3   : > { %s41_s23 = ssub.s32 %s1285_s20, %s1337_s22  ;;  %s44_s24 = sadd.s32 1, %s1281_s19 }
   0x4   : > { %p42_p0 = scmp.eq.s32.totalorder %s41_s23, 0  ;;  %p51_p1 = scmp.ne.s32.totalorder %s1281_s19, %s1277_s18 }
   0x5   : > { %p52_p2 = scmp.eq.s32.totalorder %s1285_s20, 0  ;;  %p1215_p4 = scmp.ge.s32.totalorder %s1285_s20, 2 }
   0x6   : > { %s1346_s25 = scalar_select %p42_p0, %s1281_s19, %s44_s24  }
   0x7   : > { %p53_p3 = por %p52_p2, %p51_p1  ;;  %182 = sbr.rel (%p1215_p4) target bundleno = 180 (0xb4), region = 24 }
   0xc   : > { %185 = sbr.rel (!%p53_p3) target bundleno = 180 (0xb4), region = 28  ;;  %s187_s26 = sand.u32 (%p53_p3), 1, %s1281_s19  }
   0xd   : > { %s1234_s27 = sshll.u32 (%p53_p3), %s1285_s20, 5  ;;  %s1235_s28 = smul.u32 (%p53_p3), 1312, %s187_s26 }
   0xe   : > { %s1354_s6 = scalar_lea.vmem (%p53_p3), %s1928_s1, %s1234_s27 }
   0xf   : > { %v205_v0 = vld [vmem:[%s1354_s6] sm:$0xff] (%p53_p3)  ;;  %v207_v1 = vld [vmem:[%s1354_s6 + $0x8] sm:$0xff] (%p53_p3)  ;;  %v209_v2 = vld [vmem:[%s1354_s6 + $0x10] sm:$0xff] (%p53_p3)  ;;  %s1359_s7 = scalar_lea.vmem (%p53_p3), [#allocation2], %s1235_s28 }
  0x10   : > { %206 = vst [vmem:[%s1359_s7] sm:$0xff] (%p53_p3), %v205_v0  ;;  %v211_v3 = vld [vmem:[%s1354_s6 + $0x18] sm:$0xff] (%p53_p3)  ;;  %v213_v4 = vld [vmem:[%s1354_s6 + $0x40] sm:$0xff] (%p53_p3)  ;;  %v215_v5 = vld [vmem:[%s1354_s6 + $0x48] sm:$0xff] (%p53_p3) }
  0x11   : > { %208 = vst [vmem:[%s1359_s7 + $0x8] sm:$0xff] %v207_v1  ;;  %v217_v6 = vld [vmem:[%s1354_s6 + $0x50] sm:$0xff]  ;;  %v219_v7 = vld [vmem:[%s1354_s6 + $0x58] sm:$0xff]  ;;  %v221_v8 = vld [vmem:[%s1354_s6 + $0x80] sm:$0xff] }
  0x12   : > { %210 = vst [vmem:[%s1359_s7 + $0x10] sm:$0xff] %v209_v2  ;;  %v223_v9 = vld [vmem:[%s1354_s6 + $0x88] sm:$0xff]  ;;  %v225_v10 = vld [vmem:[%s1354_s6 + $0x90] sm:$0xff]  ;;  %v227_v11 = vld [vmem:[%s1354_s6 + $0x98] sm:$0xff] }
  0x13   : > { %212 = vst [vmem:[%s1359_s7 + $0x18] sm:$0xff] %v211_v3  ;;  %v229_v12 = vld [vmem:[%s1354_s6 + $0xc0] sm:$0xff]  ;;  %v231_v13 = vld [vmem:[%s1354_s6 + $0xc8] sm:$0xff]  ;;  %v233_v14 = vld [vmem:[%s1354_s6 + $0xd0] sm:$0xff] }
  0x14   : > { %214 = vst [vmem:[%s1359_s7 + $0x20] sm:$0xff] %v213_v4  ;;  %v235_v15 = vld [vmem:[%s1354_s6 + $0xd8] sm:$0xff]  ;;  %v237_v16 = vld [vmem:[%s1354_s6 + $0x100] sm:$0xff]  ;;  %v239_v17 = vld [vmem:[%s1354_s6 + $0x108] sm:$0xff] }
  0x15   : > { %216 = vst [vmem:[%s1359_s7 + $0x28] sm:$0xff] %v215_v5  ;;  %v241_v18 = vld [vmem:[%s1354_s6 + $0x110] sm:$0xff]  ;;  %v243_v19 = vld [vmem:[%s1354_s6 + $0x118] sm:$0xff]  ;;  %v245_v20 = vld [vmem:[%s1354_s6 + $0x140] sm:$0xff] }
  0x16   : > { %218 = vst [vmem:[%s1359_s7 + $0x30] sm:$0xff] %v217_v6  ;;  %v247_v21 = vld [vmem:[%s1354_s6 + $0x148] sm:$0xff]  ;;  %v249_v22 = vld [vmem:[%s1354_s6 + $0x150] sm:$0xff]  ;;  %v251_v23 = vld [vmem:[%s1354_s6 + $0x158] sm:$0xff] }
  0x17   : > { %220 = vst [vmem:[%s1359_s7 + $0x38] sm:$0xff] %v219_v7  ;;  %v253_v24 = vld [vmem:[%s1354_s6 + $0x180] sm:$0xff]  ;;  %v255_v25 = vld [vmem:[%s1354_s6 + $0x188] sm:$0xff]  ;;  %v257_v26 = vld [vmem:[%s1354_s6 + $0x190] sm:$0xff] }
  0x18   : > { %222 = vst [vmem:[%s1359_s7 + $0x40] sm:$0xff] %v221_v8  ;;  %v259_v27 = vld [vmem:[%s1354_s6 + $0x198] sm:$0xff]  ;;  %v261_v28 = vld [vmem:[%s1354_s6 + $0x1c0] sm:$0xff]  ;;  %v263_v29 = vld [vmem:[%s1354_s6 + $0x1c8] sm:$0xff] }
  0x19   : > { %224 = vst [vmem:[%s1359_s7 + $0x48] sm:$0xff] %v223_v9  ;;  %v265_v30 = vld [vmem:[%s1354_s6 + $0x1d0] sm:$0xff]  ;;  %v267_v31 = vld [vmem:[%s1354_s6 + $0x1d8] sm:$0xff]  ;;  %v269_v32 = vld [vmem:[%s1354_s6 + $0x200] sm:$0xff] }
  0x1a   : > { %226 = vst [vmem:[%s1359_s7 + $0x50] sm:$0xff] %v225_v10  ;;  %v271_v33 = vld [vmem:[%s1354_s6 + $0x208] sm:$0xff]  ;;  %v273_v34 = vld [vmem:[%s1354_s6 + $0x210] sm:$0xff]  ;;  %v275_v35 = vld [vmem:[%s1354_s6 + $0x218] sm:$0xff] }
  0x1b   : > { %228 = vst [vmem:[%s1359_s7 + $0x58] sm:$0xff] %v227_v11  ;;  %v277_v36 = vld [vmem:[%s1354_s6 + $0x240] sm:$0xff]  ;;  %v279_v37 = vld [vmem:[%s1354_s6 + $0x248] sm:$0xff]  ;;  %v281_v38 = vld [vmem:[%s1354_s6 + $0x250] sm:$0xff] }
  0x1c   : > { %230 = vst [vmem:[%s1359_s7 + $0x60] sm:$0xff] %v229_v12  ;;  %v283_v39 = vld [vmem:[%s1354_s6 + $0x258] sm:$0xff]  ;;  %v285_v40 = vld [vmem:[%s1354_s6 + $0x280] sm:$0xff]  ;;  %v287_v41 = vld [vmem:[%s1354_s6 + $0x288] sm:$0xff] }
  0x1d   : > { %232 = vst [vmem:[%s1359_s7 + $0x68] sm:$0xff] %v231_v13  ;;  %v289_v42 = vld [vmem:[%s1354_s6 + $0x290] sm:$0xff]  ;;  %v291_v43 = vld [vmem:[%s1354_s6 + $0x298] sm:$0xff]  ;;  %v293_v44 = vld [vmem:[%s1354_s6 + $0x2c0] sm:$0xff] }
  0x1e   : > { %234 = vst [vmem:[%s1359_s7 + $0x70] sm:$0xff] %v233_v14  ;;  %v295_v45 = vld [vmem:[%s1354_s6 + $0x2c8] sm:$0xff]  ;;  %v297_v46 = vld [vmem:[%s1354_s6 + $0x2d0] sm:$0xff]  ;;  %v299_v47 = vld [vmem:[%s1354_s6 + $0x2d8] sm:$0xff] }
  0x1f   : > { %236 = vst [vmem:[%s1359_s7 + $0x78] sm:$0xff] %v235_v15  ;;  %v301_v48 = vld [vmem:[%s1354_s6 + $0x300] sm:$0xff]  ;;  %v303_v49 = vld [vmem:[%s1354_s6 + $0x308] sm:$0xff]  ;;  %v305_v50 = vld [vmem:[%s1354_s6 + $0x310] sm:$0xff] }
  0x20   : > { %238 = vst [vmem:[%s1359_s7 + $0x80] sm:$0xff] %v237_v16  ;;  %v307_v51 = vld [vmem:[%s1354_s6 + $0x318] sm:$0xff]  ;;  %v309_v52 = vld [vmem:[%s1354_s6 + $0x340] sm:$0xff]  ;;  %v311_v53 = vld [vmem:[%s1354_s6 + $0x348] sm:$0xff] }
  0x21   : > { %240 = vst [vmem:[%s1359_s7 + $0x88] sm:$0xff] %v239_v17  ;;  %v313_v54 = vld [vmem:[%s1354_s6 + $0x350] sm:$0xff]  ;;  %v315_v55 = vld [vmem:[%s1354_s6 + $0x358] sm:$0xff]  ;;  %v317_v56 = vld [vmem:[%s1354_s6 + $0x380] sm:$0xff] }
  0x22   : > { %242 = vst [vmem:[%s1359_s7 + $0x90] sm:$0xff] %v241_v18  ;;  %v319_v57 = vld [vmem:[%s1354_s6 + $0x388] sm:$0xff]  ;;  %v321_v58 = vld [vmem:[%s1354_s6 + $0x390] sm:$0xff]  ;;  %v323_v59 = vld [vmem:[%s1354_s6 + $0x398] sm:$0xff] }
  0x23   : > { %244 = vst [vmem:[%s1359_s7 + $0x98] sm:$0xff] %v243_v19  ;;  %v325_v60 = vld [vmem:[%s1354_s6 + $0x3c0] sm:$0xff]  ;;  %v327_v61 = vld [vmem:[%s1354_s6 + $0x3c8] sm:$0xff]  ;;  %v329_v62 = vld [vmem:[%s1354_s6 + $0x3d0] sm:$0xff] }
  0x24   : > { %246 = vst [vmem:[%s1359_s7 + $0xa0] sm:$0xff] %v245_v20  ;;  %v331_v63 = vld [vmem:[%s1354_s6 + $0x3d8] sm:$0xff]  ;;  %v333_v0 = vld [vmem:[%s1354_s6 + $0x400] sm:$0xff]  ;;  %v335_v1 = vld [vmem:[%s1354_s6 + $0x408] sm:$0xff] }
  0x25   : > { %248 = vst [vmem:[%s1359_s7 + $0xa8] sm:$0xff] %v247_v21  ;;  %v337_v2 = vld [vmem:[%s1354_s6 + $0x410] sm:$0xff]  ;;  %v339_v3 = vld [vmem:[%s1354_s6 + $0x418] sm:$0xff]  ;;  %v341_v4 = vld [vmem:[%s1354_s6 + $0x440] sm:$0xff] }
  0x26   : > { %250 = vst [vmem:[%s1359_s7 + $0xb0] sm:$0xff] %v249_v22  ;;  %v343_v5 = vld [vmem:[%s1354_s6 + $0x448] sm:$0xff]  ;;  %v345_v6 = vld [vmem:[%s1354_s6 + $0x450] sm:$0xff]  ;;  %v347_v7 = vld [vmem:[%s1354_s6 + $0x458] sm:$0xff] }
  0x27   : > { %252 = vst [vmem:[%s1359_s7 + $0xb8] sm:$0xff] %v251_v23  ;;  %v349_v8 = vld [vmem:[%s1354_s6 + $0x480] sm:$0xff]  ;;  %v351_v9 = vld [vmem:[%s1354_s6 + $0x488] sm:$0xff]  ;;  %v353_v10 = vld [vmem:[%s1354_s6 + $0x490] sm:$0xff] }
  0x28   : > { %254 = vst [vmem:[%s1359_s7 + $0xc0] sm:$0xff] %v253_v24  ;;  %v355_v11 = vld [vmem:[%s1354_s6 + $0x498] sm:$0xff]  ;;  %v357_v12 = vld [vmem:[%s1354_s6 + $0x4c0] sm:$0xff]  ;;  %v359_v13 = vld [vmem:[%s1354_s6 + $0x4c8] sm:$0xff] }
  0x29   : > { %256 = vst [vmem:[%s1359_s7 + $0xc8] sm:$0xff] %v255_v25  ;;  %v361_v14 = vld [vmem:[%s1354_s6 + $0x4d0] sm:$0xff]  ;;  %v363_v15 = vld [vmem:[%s1354_s6 + $0x4d8] sm:$0xff]  ;;  %v365_v16 = vld [vmem:[%s1354_s6 + $0x500] sm:$0xff] }
  0x2a   : > { %258 = vst [vmem:[%s1359_s7 + $0xd0] sm:$0xff] %v257_v26  ;;  %v367_v17 = vld [vmem:[%s1354_s6 + $0x508] sm:$0xff]  ;;  %v369_v18 = vld [vmem:[%s1354_s6 + $0x510] sm:$0xff]  ;;  %v371_v19 = vld [vmem:[%s1354_s6 + $0x518] sm:$0xff] }
  0x2b   : > { %260 = vst [vmem:[%s1359_s7 + $0xd8] sm:$0xff] %v259_v27  ;;  %v373_v20 = vld [vmem:[%s1354_s6 + $0x540] sm:$0xff]  ;;  %v375_v21 = vld [vmem:[%s1354_s6 + $0x548] sm:$0xff]  ;;  %v377_v22 = vld [vmem:[%s1354_s6 + $0x550] sm:$0xff] }
  0x2c   : > { %262 = vst [vmem:[%s1359_s7 + $0xe0] sm:$0xff] %v261_v28  ;;  %v379_v23 = vld [vmem:[%s1354_s6 + $0x558] sm:$0xff]  ;;  %v381_v24 = vld [vmem:[%s1354_s6 + $0x580] sm:$0xff]  ;;  %v383_v25 = vld [vmem:[%s1354_s6 + $0x588] sm:$0xff] }
  0x2d   : > { %264 = vst [vmem:[%s1359_s7 + $0xe8] sm:$0xff] %v263_v29  ;;  %v385_v26 = vld [vmem:[%s1354_s6 + $0x590] sm:$0xff]  ;;  %v387_v27 = vld [vmem:[%s1354_s6 + $0x598] sm:$0xff]  ;;  %v389_v28 = vld [vmem:[%s1354_s6 + $0x5c0] sm:$0xff] }
  0x2e   : > { %266 = vst [vmem:[%s1359_s7 + $0xf0] sm:$0xff] %v265_v30  ;;  %v391_v29 = vld [vmem:[%s1354_s6 + $0x5c8] sm:$0xff]  ;;  %v393_v30 = vld [vmem:[%s1354_s6 + $0x5d0] sm:$0xff] }
  0x2f   : > { %268 = vst [vmem:[%s1359_s7 + $0xf8] sm:$0xff] %v267_v31  ;;  %v395_v31 = vld [vmem:[%s1354_s6 + $0x5d8] sm:$0xff] }
  0x30   : > { %270 = vst [vmem:[%s1359_s7 + $0x100] sm:$0xff] %v269_v32  ;;  %v397_v32 = vld [vmem:[%s1354_s6 + $0x600] sm:$0xff] }
  0x31   : > { %272 = vst [vmem:[%s1359_s7 + $0x108] sm:$0xff] %v271_v33  ;;  %v399_v33 = vld [vmem:[%s1354_s6 + $0x608] sm:$0xff] }
  0x32   : > { %274 = vst [vmem:[%s1359_s7 + $0x110] sm:$0xff] %v273_v34  ;;  %v401_v34 = vld [vmem:[%s1354_s6 + $0x610] sm:$0xff] }
  0x33   : > { %276 = vst [vmem:[%s1359_s7 + $0x118] sm:$0xff] %v275_v35  ;;  %v403_v35 = vld [vmem:[%s1354_s6 + $0x618] sm:$0xff] }
  0x34   : > { %278 = vst [vmem:[%s1359_s7 + $0x120] sm:$0xff] %v277_v36  ;;  %v405_v36 = vld [vmem:[%s1354_s6 + $0x640] sm:$0xff] }
  0x35   : > { %280 = vst [vmem:[%s1359_s7 + $0x128] sm:$0xff] %v279_v37  ;;  %v407_v37 = vld [vmem:[%s1354_s6 + $0x648] sm:$0xff] }
  0x36   : > { %282 = vst [vmem:[%s1359_s7 + $0x130] sm:$0xff] %v281_v38  ;;  %v409_v38 = vld [vmem:[%s1354_s6 + $0x650] sm:$0xff] }
  0x37   : > { %284 = vst [vmem:[%s1359_s7 + $0x138] sm:$0xff] %v283_v39  ;;  %v411_v39 = vld [vmem:[%s1354_s6 + $0x658] sm:$0xff] }
  0x38   : > { %286 = vst [vmem:[%s1359_s7 + $0x140] sm:$0xff] %v285_v40  ;;  %v413_v40 = vld [vmem:[%s1354_s6 + $0x680] sm:$0xff] }
  0x39   : > { %288 = vst [vmem:[%s1359_s7 + $0x148] sm:$0xff] %v287_v41  ;;  %v415_v41 = vld [vmem:[%s1354_s6 + $0x688] sm:$0xff] }
  0x3a   : > { %290 = vst [vmem:[%s1359_s7 + $0x150] sm:$0xff] %v289_v42  ;;  %v417_v42 = vld [vmem:[%s1354_s6 + $0x690] sm:$0xff] }
  0x3b   : > { %292 = vst [vmem:[%s1359_s7 + $0x158] sm:$0xff] %v291_v43  ;;  %v419_v43 = vld [vmem:[%s1354_s6 + $0x698] sm:$0xff] }
  0x3c   : > { %294 = vst [vmem:[%s1359_s7 + $0x160] sm:$0xff] %v293_v44  ;;  %v421_v44 = vld [vmem:[%s1354_s6 + $0x6c0] sm:$0xff] }
  0x3d   : > { %296 = vst [vmem:[%s1359_s7 + $0x168] sm:$0xff] %v295_v45  ;;  %v423_v45 = vld [vmem:[%s1354_s6 + $0x6c8] sm:$0xff] }
  0x3e   : > { %298 = vst [vmem:[%s1359_s7 + $0x170] sm:$0xff] %v297_v46  ;;  %v425_v46 = vld [vmem:[%s1354_s6 + $0x6d0] sm:$0xff] }
  0x3f   : > { %300 = vst [vmem:[%s1359_s7 + $0x178] sm:$0xff] %v299_v47  ;;  %v427_v47 = vld [vmem:[%s1354_s6 + $0x6d8] sm:$0xff] }
  0x40   : > { %302 = vst [vmem:[%s1359_s7 + $0x180] sm:$0xff] %v301_v48  ;;  %v429_v48 = vld [vmem:[%s1354_s6 + $0x700] sm:$0xff] }
  0x41   : > { %304 = vst [vmem:[%s1359_s7 + $0x188] sm:$0xff] %v303_v49  ;;  %v431_v49 = vld [vmem:[%s1354_s6 + $0x708] sm:$0xff] }
  0x42   : > { %306 = vst [vmem:[%s1359_s7 + $0x190] sm:$0xff] %v305_v50  ;;  %v433_v50 = vld [vmem:[%s1354_s6 + $0x710] sm:$0xff] }
  0x43   : > { %308 = vst [vmem:[%s1359_s7 + $0x198] sm:$0xff] %v307_v51  ;;  %v435_v51 = vld [vmem:[%s1354_s6 + $0x718] sm:$0xff] }
  0x44   : > { %310 = vst [vmem:[%s1359_s7 + $0x1a0] sm:$0xff] %v309_v52  ;;  %v437_v52 = vld [vmem:[%s1354_s6 + $0x740] sm:$0xff] }
  0x45   : > { %312 = vst [vmem:[%s1359_s7 + $0x1a8] sm:$0xff] %v311_v53  ;;  %v439_v53 = vld [vmem:[%s1354_s6 + $0x748] sm:$0xff] }
  0x46   : > { %314 = vst [vmem:[%s1359_s7 + $0x1b0] sm:$0xff] %v313_v54  ;;  %v441_v54 = vld [vmem:[%s1354_s6 + $0x750] sm:$0xff] }
  0x47   : > { %316 = vst [vmem:[%s1359_s7 + $0x1b8] sm:$0xff] %v315_v55  ;;  %v443_v55 = vld [vmem:[%s1354_s6 + $0x758] sm:$0xff] }
  0x48   : > { %318 = vst [vmem:[%s1359_s7 + $0x1c0] sm:$0xff] %v317_v56  ;;  %v445_v56 = vld [vmem:[%s1354_s6 + $0x780] sm:$0xff] }
  0x49   : > { %320 = vst [vmem:[%s1359_s7 + $0x1c8] sm:$0xff] %v319_v57  ;;  %v447_v57 = vld [vmem:[%s1354_s6 + $0x788] sm:$0xff] }
  0x4a   : > { %322 = vst [vmem:[%s1359_s7 + $0x1d0] sm:$0xff] %v321_v58  ;;  %v449_v58 = vld [vmem:[%s1354_s6 + $0x790] sm:$0xff] }
  0x4b   : > { %324 = vst [vmem:[%s1359_s7 + $0x1d8] sm:$0xff] %v323_v59  ;;  %v451_v59 = vld [vmem:[%s1354_s6 + $0x798] sm:$0xff] }
  0x4c   : > { %326 = vst [vmem:[%s1359_s7 + $0x1e0] sm:$0xff] %v325_v60  ;;  %v453_v60 = vld [vmem:[%s1354_s6 + $0x7c0] sm:$0xff] }
  0x4d   : > { %328 = vst [vmem:[%s1359_s7 + $0x1e8] sm:$0xff] %v327_v61  ;;  %v455_v61 = vld [vmem:[%s1354_s6 + $0x7c8] sm:$0xff] }
  0x4e   : > { %330 = vst [vmem:[%s1359_s7 + $0x1f0] sm:$0xff] %v329_v62  ;;  %v457_v62 = vld [vmem:[%s1354_s6 + $0x7d0] sm:$0xff] }
  0x4f   : > { %332 = vst [vmem:[%s1359_s7 + $0x1f8] sm:$0xff] %v331_v63  ;;  %v459_v63 = vld [vmem:[%s1354_s6 + $0x7d8] sm:$0xff] }
  0x50   : > { %334 = vst [vmem:[%s1359_s7 + $0x200] sm:$0xff] %v333_v0  ;;  %v461_v0 = vld [vmem:[%s1354_s6 + $0x800] sm:$0xff] }
  0x51   : > { %336 = vst [vmem:[%s1359_s7 + $0x208] sm:$0xff] %v335_v1  ;;  %v463_v1 = vld [vmem:[%s1354_s6 + $0x808] sm:$0xff] }
  0x52   : > { %338 = vst [vmem:[%s1359_s7 + $0x210] sm:$0xff] %v337_v2  ;;  %v465_v2 = vld [vmem:[%s1354_s6 + $0x810] sm:$0xff] }
  0x53   : > { %340 = vst [vmem:[%s1359_s7 + $0x218] sm:$0xff] %v339_v3  ;;  %v467_v3 = vld [vmem:[%s1354_s6 + $0x818] sm:$0xff] }
  0x54   : > { %342 = vst [vmem:[%s1359_s7 + $0x220] sm:$0xff] %v341_v4  ;;  %v469_v4 = vld [vmem:[%s1354_s6 + $0x840] sm:$0xff] }
  0x55   : > { %344 = vst [vmem:[%s1359_s7 + $0x228] sm:$0xff] %v343_v5  ;;  %v471_v5 = vld [vmem:[%s1354_s6 + $0x848] sm:$0xff] }
  0x56   : > { %346 = vst [vmem:[%s1359_s7 + $0x230] sm:$0xff] %v345_v6  ;;  %v473_v6 = vld [vmem:[%s1354_s6 + $0x850] sm:$0xff] }
  0x57   : > { %348 = vst [vmem:[%s1359_s7 + $0x238] sm:$0xff] %v347_v7  ;;  %v475_v7 = vld [vmem:[%s1354_s6 + $0x858] sm:$0xff] }
  0x58   : > { %350 = vst [vmem:[%s1359_s7 + $0x240] sm:$0xff] %v349_v8  ;;  %v477_v8 = vld [vmem:[%s1354_s6 + $0x880] sm:$0xff] }
  0x59   : > { %352 = vst [vmem:[%s1359_s7 + $0x248] sm:$0xff] %v351_v9  ;;  %v479_v9 = vld [vmem:[%s1354_s6 + $0x888] sm:$0xff] }
  0x5a   : > { %354 = vst [vmem:[%s1359_s7 + $0x250] sm:$0xff] %v353_v10  ;;  %v481_v10 = vld [vmem:[%s1354_s6 + $0x890] sm:$0xff] }
  0x5b   : > { %356 = vst [vmem:[%s1359_s7 + $0x258] sm:$0xff] %v355_v11  ;;  %v483_v11 = vld [vmem:[%s1354_s6 + $0x898] sm:$0xff] }
  0x5c   : > { %358 = vst [vmem:[%s1359_s7 + $0x260] sm:$0xff] %v357_v12  ;;  %v485_v12 = vld [vmem:[%s1354_s6 + $0x8c0] sm:$0xff] }
  0x5d   : > { %360 = vst [vmem:[%s1359_s7 + $0x268] sm:$0xff] %v359_v13  ;;  %v487_v13 = vld [vmem:[%s1354_s6 + $0x8c8] sm:$0xff] }
  0x5e   : > { %362 = vst [vmem:[%s1359_s7 + $0x270] sm:$0xff] %v361_v14  ;;  %v489_v14 = vld [vmem:[%s1354_s6 + $0x8d0] sm:$0xff] }
  0x5f   : > { %364 = vst [vmem:[%s1359_s7 + $0x278] sm:$0xff] %v363_v15  ;;  %v491_v15 = vld [vmem:[%s1354_s6 + $0x8d8] sm:$0xff] }
  0x60   : > { %366 = vst [vmem:[%s1359_s7 + $0x280] sm:$0xff] %v365_v16  ;;  %v493_v16 = vld [vmem:[%s1354_s6 + $0x900] sm:$0xff] }
  0x61   : > { %368 = vst [vmem:[%s1359_s7 + $0x288] sm:$0xff] %v367_v17  ;;  %v495_v17 = vld [vmem:[%s1354_s6 + $0x908] sm:$0xff] }
  0x62   : > { %370 = vst [vmem:[%s1359_s7 + $0x290] sm:$0xff] %v369_v18  ;;  %v497_v18 = vld [vmem:[%s1354_s6 + $0x910] sm:$0xff] }
  0x63   : > { %372 = vst [vmem:[%s1359_s7 + $0x298] sm:$0xff] %v371_v19  ;;  %v499_v19 = vld [vmem:[%s1354_s6 + $0x918] sm:$0xff] }
  0x64   : > { %374 = vst [vmem:[%s1359_s7 + $0x2a0] sm:$0xff] %v373_v20  ;;  %v501_v20 = vld [vmem:[%s1354_s6 + $0x940] sm:$0xff] }
  0x65   : > { %376 = vst [vmem:[%s1359_s7 + $0x2a8] sm:$0xff] %v375_v21  ;;  %v503_v21 = vld [vmem:[%s1354_s6 + $0x948] sm:$0xff] }
  0x66   : > { %378 = vst [vmem:[%s1359_s7 + $0x2b0] sm:$0xff] %v377_v22  ;;  %v505_v22 = vld [vmem:[%s1354_s6 + $0x950] sm:$0xff] }
  0x67   : > { %380 = vst [vmem:[%s1359_s7 + $0x2b8] sm:$0xff] %v379_v23  ;;  %v507_v23 = vld [vmem:[%s1354_s6 + $0x958] sm:$0xff] }
  0x68   : > { %382 = vst [vmem:[%s1359_s7 + $0x2c0] sm:$0xff] %v381_v24  ;;  %v509_v24 = vld [vmem:[%s1354_s6 + $0x980] sm:$0xff] }
  0x69   : > { %384 = vst [vmem:[%s1359_s7 + $0x2c8] sm:$0xff] %v383_v25  ;;  %v511_v25 = vld [vmem:[%s1354_s6 + $0x988] sm:$0xff] }
  0x6a   : > { %386 = vst [vmem:[%s1359_s7 + $0x2d0] sm:$0xff] %v385_v26  ;;  %v513_v26 = vld [vmem:[%s1354_s6 + $0x990] sm:$0xff] }
  0x6b   : > { %388 = vst [vmem:[%s1359_s7 + $0x2d8] sm:$0xff] %v387_v27  ;;  %v515_v27 = vld [vmem:[%s1354_s6 + $0x998] sm:$0xff] }
  0x6c   : > { %390 = vst [vmem:[%s1359_s7 + $0x2e0] sm:$0xff] %v389_v28  ;;  %v517_v28 = vld [vmem:[%s1354_s6 + $0x9c0] sm:$0xff] }
  0x6d   : > { %392 = vst [vmem:[%s1359_s7 + $0x2e8] sm:$0xff] %v391_v29  ;;  %v519_v29 = vld [vmem:[%s1354_s6 + $0x9c8] sm:$0xff] }
  0x6e   : > { %394 = vst [vmem:[%s1359_s7 + $0x2f0] sm:$0xff] %v393_v30  ;;  %v521_v30 = vld [vmem:[%s1354_s6 + $0x9d0] sm:$0xff] }
  0x6f   : > { %396 = vst [vmem:[%s1359_s7 + $0x2f8] sm:$0xff] %v395_v31  ;;  %v523_v31 = vld [vmem:[%s1354_s6 + $0x9d8] sm:$0xff] }
  0x70   : > { %398 = vst [vmem:[%s1359_s7 + $0x300] sm:$0xff] %v397_v32  ;;  %v525_v32 = vld [vmem:[%s1354_s6 + $0xa00] sm:$0xff] }
  0x71   : > { %400 = vst [vmem:[%s1359_s7 + $0x308] sm:$0xff] %v399_v33  ;;  %v527_v33 = vld [vmem:[%s1354_s6 + $0xa08] sm:$0xff] }
  0x72   : > { %402 = vst [vmem:[%s1359_s7 + $0x310] sm:$0xff] %v401_v34  ;;  %v529_v34 = vld [vmem:[%s1354_s6 + $0xa10] sm:$0xff] }
  0x73   : > { %404 = vst [vmem:[%s1359_s7 + $0x318] sm:$0xff] %v403_v35  ;;  %v531_v35 = vld [vmem:[%s1354_s6 + $0xa18] sm:$0xff] }
  0x74   : > { %406 = vst [vmem:[%s1359_s7 + $0x320] sm:$0xff] %v405_v36 }
  0x75   : > { %408 = vst [vmem:[%s1359_s7 + $0x328] sm:$0xff] %v407_v37 }
  0x76   : > { %410 = vst [vmem:[%s1359_s7 + $0x330] sm:$0xff] %v409_v38 }
  0x77   : > { %412 = vst [vmem:[%s1359_s7 + $0x338] sm:$0xff] %v411_v39 }
  0x78   : > { %414 = vst [vmem:[%s1359_s7 + $0x340] sm:$0xff] %v413_v40 }
  0x79   : > { %416 = vst [vmem:[%s1359_s7 + $0x348] sm:$0xff] %v415_v41 }
  0x7a   : > { %418 = vst [vmem:[%s1359_s7 + $0x350] sm:$0xff] %v417_v42 }
  0x7b   : > { %420 = vst [vmem:[%s1359_s7 + $0x358] sm:$0xff] %v419_v43 }
  0x7c   : > { %422 = vst [vmem:[%s1359_s7 + $0x360] sm:$0xff] %v421_v44 }
  0x7d   : > { %424 = vst [vmem:[%s1359_s7 + $0x368] sm:$0xff] %v423_v45 }
  0x7e   : > { %426 = vst [vmem:[%s1359_s7 + $0x370] sm:$0xff] %v425_v46 }
  0x7f   : > { %428 = vst [vmem:[%s1359_s7 + $0x378] sm:$0xff] %v427_v47 }
  0x80   : > { %430 = vst [vmem:[%s1359_s7 + $0x380] sm:$0xff] %v429_v48 }
  0x81   : > { %432 = vst [vmem:[%s1359_s7 + $0x388] sm:$0xff] %v431_v49 }
  0x82   : > { %434 = vst [vmem:[%s1359_s7 + $0x390] sm:$0xff] %v433_v50 }
  0x83   : > { %436 = vst [vmem:[%s1359_s7 + $0x398] sm:$0xff] %v435_v51 }
  0x84   : > { %438 = vst [vmem:[%s1359_s7 + $0x3a0] sm:$0xff] %v437_v52 }
  0x85   : > { %440 = vst [vmem:[%s1359_s7 + $0x3a8] sm:$0xff] %v439_v53 }
  0x86   : > { %442 = vst [vmem:[%s1359_s7 + $0x3b0] sm:$0xff] %v441_v54 }
  0x87   : > { %444 = vst [vmem:[%s1359_s7 + $0x3b8] sm:$0xff] %v443_v55 }
  0x88   : > { %446 = vst [vmem:[%s1359_s7 + $0x3c0] sm:$0xff] %v445_v56 }
  0x89   : > { %448 = vst [vmem:[%s1359_s7 + $0x3c8] sm:$0xff] %v447_v57 }
  0x8a   : > { %450 = vst [vmem:[%s1359_s7 + $0x3d0] sm:$0xff] %v449_v58 }
  0x8b   : > { %452 = vst [vmem:[%s1359_s7 + $0x3d8] sm:$0xff] %v451_v59 }
  0x8c   : > { %454 = vst [vmem:[%s1359_s7 + $0x3e0] sm:$0xff] %v453_v60 }
  0x8d   : > { %456 = vst [vmem:[%s1359_s7 + $0x3e8] sm:$0xff] %v455_v61 }
  0x8e   : > { %458 = vst [vmem:[%s1359_s7 + $0x3f0] sm:$0xff] %v457_v62 }
  0x8f   : > { %460 = vst [vmem:[%s1359_s7 + $0x3f8] sm:$0xff] %v459_v63 }
  0x90   : > { %462 = vst [vmem:[%s1359_s7 + $0x400] sm:$0xff] %v461_v0 }
  0x91   : > { %464 = vst [vmem:[%s1359_s7 + $0x408] sm:$0xff] %v463_v1 }
  0x92   : > { %466 = vst [vmem:[%s1359_s7 + $0x410] sm:$0xff] %v465_v2 }
  0x93   : > { %468 = vst [vmem:[%s1359_s7 + $0x418] sm:$0xff] %v467_v3 }
  0x94   : > { %470 = vst [vmem:[%s1359_s7 + $0x420] sm:$0xff] %v469_v4 }
  0x95   : > { %472 = vst [vmem:[%s1359_s7 + $0x428] sm:$0xff] %v471_v5 }
  0x96   : > { %474 = vst [vmem:[%s1359_s7 + $0x430] sm:$0xff] %v473_v6 }
  0x97   : > { %476 = vst [vmem:[%s1359_s7 + $0x438] sm:$0xff] %v475_v7 }
  0x98   : > { %478 = vst [vmem:[%s1359_s7 + $0x440] sm:$0xff] %v477_v8 }
  0x99   : > { %480 = vst [vmem:[%s1359_s7 + $0x448] sm:$0xff] %v479_v9 }
  0x9a   : > { %482 = vst [vmem:[%s1359_s7 + $0x450] sm:$0xff] %v481_v10 }
  0x9b   : > { %484 = vst [vmem:[%s1359_s7 + $0x458] sm:$0xff] %v483_v11 }
  0x9c   : > { %486 = vst [vmem:[%s1359_s7 + $0x460] sm:$0xff] %v485_v12 }
  0x9d   : > { %488 = vst [vmem:[%s1359_s7 + $0x468] sm:$0xff] %v487_v13 }
  0x9e   : > { %490 = vst [vmem:[%s1359_s7 + $0x470] sm:$0xff] %v489_v14 }
  0x9f   : > { %492 = vst [vmem:[%s1359_s7 + $0x478] sm:$0xff] %v491_v15 }
  0xa0   : > { %494 = vst [vmem:[%s1359_s7 + $0x480] sm:$0xff] %v493_v16 }
  0xa1   : > { %496 = vst [vmem:[%s1359_s7 + $0x488] sm:$0xff] %v495_v17 }
  0xa2   : > { %498 = vst [vmem:[%s1359_s7 + $0x490] sm:$0xff] %v497_v18 }
  0xa3   : > { %500 = vst [vmem:[%s1359_s7 + $0x498] sm:$0xff] %v499_v19 }
  0xa4   : > { %502 = vst [vmem:[%s1359_s7 + $0x4a0] sm:$0xff] %v501_v20 }
  0xa5   : > { %504 = vst [vmem:[%s1359_s7 + $0x4a8] sm:$0xff] %v503_v21 }
  0xa6   : > { %506 = vst [vmem:[%s1359_s7 + $0x4b0] sm:$0xff] %v505_v22 }
  0xa7   : > { %508 = vst [vmem:[%s1359_s7 + $0x4b8] sm:$0xff] %v507_v23 }
  0xa8   : > { %510 = vst [vmem:[%s1359_s7 + $0x4c0] sm:$0xff] %v509_v24 }
  0xa9   : > { %512 = vst [vmem:[%s1359_s7 + $0x4c8] sm:$0xff] %v511_v25 }
  0xaa   : > { %514 = vst [vmem:[%s1359_s7 + $0x4d0] sm:$0xff] %v513_v26 }
  0xab   : > { %516 = vst [vmem:[%s1359_s7 + $0x4d8] sm:$0xff] %v515_v27 }
  0xac   : > { %518 = vst [vmem:[%s1359_s7 + $0x4e0] sm:$0xff] %v517_v28 }
  0xad   : > { %520 = vst [vmem:[%s1359_s7 + $0x4e8] sm:$0xff] %v519_v29 }
  0xae   : > { %522 = vst [vmem:[%s1359_s7 + $0x4f0] sm:$0xff] %v521_v30 }
  0xaf   : > { %524 = vst [vmem:[%s1359_s7 + $0x4f8] sm:$0xff] %v523_v31 }
  0xb0   : > { %526 = vst [vmem:[%s1359_s7 + $0x500] sm:$0xff] %v525_v32 }
  0xb1   : > { %528 = vst [vmem:[%s1359_s7 + $0x508] sm:$0xff] %v527_v33 }
  0xb2   : > { %530 = vst [vmem:[%s1359_s7 + $0x510] sm:$0xff] %v529_v34 }
  0xb3   : > { %532 = vst [vmem:[%s1359_s7 + $0x518] sm:$0xff] %v531_v35 }
  0xb4 PF: > { %p1218_p5 = scmp.ge.s32.totalorder %s1285_s20, 1  ;;  %p537_p6 = scmp.lt.s32.totalorder %s1285_s20, 3 }
  0xb6   : > { %p538_p7 = pnand %p1218_p5, %p537_p6 }
  0xb7   : > { %s544_s8 = sand.u32 (!%p538_p7), 1, %s1277_s18   ;;  %s1219_s17 = sshll.u32 (!%p538_p7), %s1334_s21, 2 }
  0xb8   : > { %541 = sbr.rel (%p538_p7) target bundleno = 548 (0x224), region = 51  ;;  %p581_p8 = scmp.lt.s32.totalorder (!%p538_p7), %s1219_s17, 7 }
  0xb9   : > { %s1236_s9 = smul.u32 (!%p538_p7), 1312, %s544_s8  ;;  %s1231_s26 = sshll.u32 (!%p538_p7), %s1334_s21, 9 }
  0xba   : > { %p586_p9 = scmp.lt.s32.totalorder (!%p538_p7), %s1334_s21, 1 }
  0xbb   : > { %s1689_s10 = scalar_lea.vmem (!%p538_p7), [#allocation2], %s1236_s9 }
  0xbd   : > { %vm779_vm0 = vcmask 1043456   ;;  %v720_v36 = vld [vmem:[%s1689_s10 + $0x3e0] sm:$0xff]  ;;  %v657_v37 = vld [vmem:[%s1689_s10 + $0x1e8] sm:$0xff]  ;;  %v658_v35 = vld [vmem:[%s1689_s10 + $0x1f0] sm:$0xff]  ;;  %vm776_vm1 = vcmask 556032   ;;  %s1937_s17 = smov (!%p581_p8, %s1219_s17), 7 }
  0xbe   : > { %v716_v38 = vld [vmem:[%s1689_s10 + $0x3c0] sm:$0xff]  ;;  %812 = vmatpush.msra.mxu1 %v720_v36  ;;  %852 = vmatpush.msra.mxu3 %v657_v37  ;;  %v653_v40 = vld [vmem:[%s1689_s10 + $0x1c8] sm:$0xff]  ;;  %v722_v36 = vld [vmem:[%s1689_s10 + $0x3f0] sm:$0xff]  ;;  %s1220_s18 = sshll.u32 %s1937_s17, 2  ;;  %s1939_s21 = smov (!%p586_p9, %s1334_s21), 1  ;;  %vm1072_vm6 = vcmask 3072  }
  0xbf   : > { %v756_v39 = vld [vmem:[%s1689_s10 + $0x500] sm:$0xf]  ;;  %v649_v43 = vld [vmem:[%s1689_s10 + $0x1a8] sm:$0xff]  ;;  %s1894_s24 = scalar_lea.vmem %s1930_s3, %s1220_s18  ;;  %s1221_s27 = sshll.u32 %s1939_s21, 2 }
  0xc0   : > { %v712_v41 = vld [vmem:[%s1689_s10 + $0x3a0] sm:$0xff]  ;;  %1223 = vmatpush.msk.msra.mxu2 %vm779_vm0, %v756_v39  ;;  %813 = vmatpush.msra.mxu1 %v716_v38  ;;  %v645_v47 = vld [vmem:[%s1689_s10 + $0x188] sm:$0xff]  ;;  %v654_v39 = vld [vmem:[%s1689_s10 + $0x1d0] sm:$0xff]  ;;  %s589_s30 = scalar_lea.vmem %s1931_s4, %s1221_s27  ;;  %s593_s8 = scalar_lea.vmem %s1932_s5, %s1221_s27 }
  0xc1   : > { %v752_v42 = vld [vmem:[%s1689_s10 + $0x4e0] sm:$0xff]  ;;  %853 = vmatpush.msra.mxu3 %v653_v40  ;;  %v641_v52 = vld [vmem:[%s1689_s10 + $0x168] sm:$0xff]  ;;  %v718_v40 = vld [vmem:[%s1689_s10 + $0x3d0] sm:$0xff] }
  0xc2   : > { %v656_v44 = vld [vmem:[%s1689_s10 + $0x1e0] sm:$0xff]  ;;  %840 = vmatpush.msra.mxu2 %v752_v42  ;;  %814 = vmatpush.msra.mxu1 %v712_v41  ;;  %v637_v56 = vld [vmem:[%s1689_s10 + $0x148] sm:$0xff]  ;;  %v594_v42 = vld [vmem:[%s1927_s0] sm:$0xff] }
  0xc3   : > { %v748_v45 = vld [vmem:[%s1689_s10 + $0x4c0] sm:$0xff]  ;;  %792 = vmatpush.msra.mxu0 %v656_v44  ;;  %854 = vmatpush.msra.mxu3 %v649_v43  ;;  %v633_v60 = vld [vmem:[%s1689_s10 + $0x128] sm:$0xff]  ;;  %v650_v44 = vld [vmem:[%s1689_s10 + $0x1b0] sm:$0xff]  ;;  %768 = vst [vmem:[#allocation1] ss:$2 sm:$0xff] %v594_v42 }
  0xc4   : > { %v708_v46 = vld [vmem:[%s1689_s10 + $0x380] sm:$0xff]  ;;  %841 = vmatpush.msra.mxu2 %v748_v45  ;;  %v629_v0 = vld [vmem:[%s1689_s10 + $0x108] sm:$0xff]  ;;  %v714_v45 = vld [vmem:[%s1689_s10 + $0x3b0] sm:$0xff] }
  0xc5   : > { %v652_v48 = vld [vmem:[%s1689_s10 + $0x1c0] sm:$0xff]  ;;  %815 = vmatpush.msra.mxu1 %v708_v46  ;;  %855 = vmatpush.msra.mxu3 %v645_v47  ;;  %v625_v4 = vld [vmem:[%s1689_s10 + $0xe8] sm:$0xff]  ;;  %v719_v42 = vld [vmem:[%s1689_s10 + $0x3d8] sm:$0xff] }
  0xc6   : > { %v744_v49 = vld [vmem:[%s1689_s10 + $0x4a0] sm:$0xff]  ;;  %793 = vmatpush.msra.mxu0 %v652_v48  ;;  %v621_v8 = vld [vmem:[%s1689_s10 + $0xc8] sm:$0xff]  ;;  %v646_v48 = vld [vmem:[%s1689_s10 + $0x190] sm:$0xff] }
  0xc7   : > { %v648_v50 = vld [vmem:[%s1689_s10 + $0x1a0] sm:$0xff]  ;;  %842 = vmatpush.msra.mxu2 %v744_v49  ;;  %856 = vmatpush.msra.mxu3 %v641_v52  ;;  %v721_v9 = vld [vmem:[%s1689_s10 + $0x3e8] sm:$0xff]  ;;  %v710_v49 = vld [vmem:[%s1689_s10 + $0x390] sm:$0xff] }
  0xc8   : > { %v704_v51 = vld [vmem:[%s1689_s10 + $0x360] sm:$0xff]  ;;  %794 = vmatpush.msra.mxu0 %v648_v50  ;;  %v617_v12 = vld [vmem:[%s1689_s10 + $0xa8] sm:$0xff]  ;;  %v642_v52 = vld [vmem:[%s1689_s10 + $0x170] sm:$0xff] }
  0xc9   : > { %v740_v53 = vld [vmem:[%s1689_s10 + $0x480] sm:$0xff]  ;;  %816 = vmatpush.msra.mxu1 %v704_v51  ;;  %857 = vmatpush.msra.mxu3 %v637_v56  ;;  %v717_v13 = vld [vmem:[%s1689_s10 + $0x3c8] sm:$0xff]  ;;  %v638_v56 = vld [vmem:[%s1689_s10 + $0x150] sm:$0xff] }
  0xca   : > { %v644_v54 = vld [vmem:[%s1689_s10 + $0x180] sm:$0xff]  ;;  %843 = vmatpush.msra.mxu2 %v740_v53  ;;  %v613_v16 = vld [vmem:[%s1689_s10 + $0x88] sm:$0xff]  ;;  %v706_v53 = vld [vmem:[%s1689_s10 + $0x370] sm:$0xff] }
  0xcb   : > { %v700_v55 = vld [vmem:[%s1689_s10 + $0x340] sm:$0xff]  ;;  %795 = vmatpush.msra.mxu0 %v644_v54  ;;  %858 = vmatpush.msra.mxu3 %v633_v60  ;;  %v713_v17 = vld [vmem:[%s1689_s10 + $0x3a8] sm:$0xff] }
  0xcc   : > { %v736_v57 = vld [vmem:[%s1689_s10 + $0x460] sm:$0xff]  ;;  %817 = vmatpush.msra.mxu1 %v700_v55  ;;  %v609_v20 = vld [vmem:[%s1689_s10 + $0x68] sm:$0xff] }
  0xcd   : > { %v640_v58 = vld [vmem:[%s1689_s10 + $0x160] sm:$0xff]  ;;  %844 = vmatpush.msra.mxu2 %v736_v57  ;;  %859 = vmatpush.msra.mxu3 %v629_v0  ;;  %v709_v21 = vld [vmem:[%s1689_s10 + $0x388] sm:$0xff]  ;;  %v702_v57 = vld [vmem:[%s1689_s10 + $0x350] sm:$0xff] }
  0xce   : > { %v696_v59 = vld [vmem:[%s1689_s10 + $0x320] sm:$0xff]  ;;  %796 = vmatpush.msra.mxu0 %v640_v58  ;;  %v605_v24 = vld [vmem:[%s1689_s10 + $0x48] sm:$0xff] }
  0xcf   : > { %v732_v61 = vld [vmem:[%s1689_s10 + $0x440] sm:$0xff]  ;;  %818 = vmatpush.msra.mxu1 %v696_v59  ;;  %860 = vmatpush.msra.mxu3 %v625_v4  ;;  %v705_v25 = vld [vmem:[%s1689_s10 + $0x368] sm:$0xff] }
  0xd0   : > { %v636_v62 = vld [vmem:[%s1689_s10 + $0x140] sm:$0xff]  ;;  %845 = vmatpush.msra.mxu2 %v732_v61  ;;  %v601_v28 = vld [vmem:[%s1689_s10 + $0x28] sm:$0xff]  ;;  %v634_v61 = vld [vmem:[%s1689_s10 + $0x130] sm:$0xff] }
  0xd1   : > { %v692_v63 = vld [vmem:[%s1689_s10 + $0x300] sm:$0xff]  ;;  %797 = vmatpush.msra.mxu0 %v636_v62  ;;  %861 = vmatpush.msra.mxu3 %v621_v8  ;;  %v701_v29 = vld [vmem:[%s1689_s10 + $0x348] sm:$0xff]  ;;  %v698_v62 = vld [vmem:[%s1689_s10 + $0x330] sm:$0xff] }
  0xd2   : > { %v728_v1 = vld [vmem:[%s1689_s10 + $0x420] sm:$0xff]  ;;  %819 = vmatpush.msra.mxu1 %v692_v63  ;;  %v597_v32 = vld [vmem:[%s1689_s10 + $0x8] sm:$0xff] }
  0xd3   : > { %v632_v2 = vld [vmem:[%s1689_s10 + $0x120] sm:$0xff]  ;;  %846 = vmatpush.msra.mxu2 %v728_v1  ;;  %862 = vmatpush.msra.mxu3 %v617_v12  ;;  %v697_v34 = vld [vmem:[%s1689_s10 + $0x328] sm:$0xff]  ;;  %v630_v1 = vld [vmem:[%s1689_s10 + $0x110] sm:$0xff] }
  0xd4   : > { %v688_v3 = vld [vmem:[%s1689_s10 + $0x2e0] sm:$0xff]  ;;  %798 = vmatpush.msra.mxu0 %v632_v2  ;;  %v693_v38 = vld [vmem:[%s1689_s10 + $0x308] sm:$0xff]  ;;  %v694_v2 = vld [vmem:[%s1689_s10 + $0x310] sm:$0xff] }
  0xd5   : > { %v724_v5 = vld [vmem:[%s1689_s10 + $0x400] sm:$0xff]  ;;  %820 = vmatpush.msra.mxu1 %v688_v3  ;;  %863 = vmatpush.msra.mxu3 %v613_v16  ;;  %v689_v43 = vld [vmem:[%s1689_s10 + $0x2e8] sm:$0xff]  ;;  %v682_v16 = vld [vmem:[%s1689_s10 + $0x2b0] sm:$0xff] }
  0xd6   : > { %v628_v6 = vld [vmem:[%s1689_s10 + $0x100] sm:$0xff]  ;;  %847 = vmatpush.msra.mxu2 %v724_v5  ;;  %v757_v46 = vld [vmem:[%s1689_s10 + $0x508] sm:$0xf]  ;;  %v626_v5 = vld [vmem:[%s1689_s10 + $0xf0] sm:$0xff] }
  0xd7   : > { %v684_v7 = vld [vmem:[%s1689_s10 + $0x2c0] sm:$0xff]  ;;  %799 = vmatpush.msra.mxu0 %v628_v6  ;;  %864 = vmatpush.msra.mxu3 %v609_v20  ;;  %v685_v47 = vld [vmem:[%s1689_s10 + $0x2c8] sm:$0xff]  ;;  %v690_v6 = vld [vmem:[%s1689_s10 + $0x2f0] sm:$0xff] }
  0xd8   : > { %v624_v10 = vld [vmem:[%s1689_s10 + $0xe0] sm:$0xff]  ;;  %821 = vmatpush.msra.mxu1 %v684_v7  ;;  %872 = vmatpush.msrb.mxu2 %v721_v9  ;;  %v753_v50 = vld [vmem:[%s1689_s10 + $0x4e8] sm:$0xff]  ;;  %v1799_v7 = vld.sshfl [vmem:[#allocation1] sm:$0xff pattern:$0x75316420] }
  0xd9   : > { %v680_v11 = vld [vmem:[%s1689_s10 + $0x2a0] sm:$0xff]  ;;  %800 = vmatpush.msra.mxu0 %v624_v10  ;;  %865 = vmatpush.msra.mxu3 %v605_v24  ;;  %v681_v51 = vld [vmem:[%s1689_s10 + $0x2a8] sm:$0xff]  ;;  %v622_v10 = vld [vmem:[%s1689_s10 + $0xd0] sm:$0xff] }
  0xda   : > { %v620_v14 = vld [vmem:[%s1689_s10 + $0xc0] sm:$0xff]  ;;  %822 = vmatpush.msra.mxu1 %v680_v11  ;;  %873 = vmatpush.msrb.mxu2 %v717_v13  ;;  %v749_v54 = vld [vmem:[%s1689_s10 + $0x4c8] sm:$0xff]  ;;  %v686_v11 = vld [vmem:[%s1689_s10 + $0x2d0] sm:$0xff] }
  0xdb   : > { %v676_v15 = vld [vmem:[%s1689_s10 + $0x280] sm:$0xff]  ;;  %801 = vmatpush.msra.mxu0 %v620_v14  ;;  %866 = vmatpush.msra.mxu3 %v601_v28  ;;  %v677_v55 = vld [vmem:[%s1689_s10 + $0x288] sm:$0xff]  ;;  %v659_v14 = vld [vmem:[%s1689_s10 + $0x1f8] sm:$0xff] }
  0xdc   : > { %v616_v18 = vld [vmem:[%s1689_s10 + $0xa0] sm:$0xff]  ;;  %823 = vmatpush.msra.mxu1 %v676_v15  ;;  %874 = vmatpush.msrb.mxu2 %v713_v17  ;;  %v745_v59 = vld [vmem:[%s1689_s10 + $0x4a8] sm:$0xff]  ;;  %v618_v15 = vld [vmem:[%s1689_s10 + $0xb0] sm:$0xff] }
  0xdd   : > { %v672_v19 = vld [vmem:[%s1689_s10 + $0x260] sm:$0xff]  ;;  %802 = vmatpush.msra.mxu0 %v616_v18  ;;  %867 = vmatpush.msra.mxu3 %v597_v32  ;;  %v673_v60 = vld [vmem:[%s1689_s10 + $0x268] sm:$0xff]  ;;  %v655_v18 = vld [vmem:[%s1689_s10 + $0x1d8] sm:$0xff] }
  0xde   : > { %v612_v22 = vld [vmem:[%s1689_s10 + $0x80] sm:$0xff]  ;;  %824 = vmatpush.msra.mxu1 %v672_v19  ;;  %875 = vmatpush.msrb.mxu2 %v709_v21  ;;  %v741_v63 = vld [vmem:[%s1689_s10 + $0x488] sm:$0xff]  ;;  %v614_v19 = vld [vmem:[%s1689_s10 + $0x90] sm:$0xff] }
  0xdf   : > { %v668_v23 = vld [vmem:[%s1689_s10 + $0x240] sm:$0xff]  ;;  %803 = vmatpush.msra.mxu0 %v612_v22  ;;  %932 = vmatpush.msrb.mxu3 %v722_v36  ;;  %v669_v0 = vld [vmem:[%s1689_s10 + $0x248] sm:$0xff]  ;;  %v678_v20 = vld [vmem:[%s1689_s10 + $0x290] sm:$0xff] }
  0xe0   : > { %v608_v26 = vld [vmem:[%s1689_s10 + $0x60] sm:$0xff]  ;;  %825 = vmatpush.msra.mxu1 %v668_v23  ;;  %876 = vmatpush.msrb.mxu2 %v705_v25  ;;  %v737_v3 = vld [vmem:[%s1689_s10 + $0x468] sm:$0xff]  ;;  %v758_v21 = vld [vmem:[%s1689_s10 + $0x510] sm:$0xf] }
  0xe1   : > { %v664_v27 = vld [vmem:[%s1689_s10 + $0x220] sm:$0xff]  ;;  %804 = vmatpush.msra.mxu0 %v608_v26  ;;  %933 = vmatpush.msrb.mxu3 %v718_v40  ;;  %v665_v4 = vld [vmem:[%s1689_s10 + $0x228] sm:$0xff]  ;;  %v651_v22 = vld [vmem:[%s1689_s10 + $0x1b8] sm:$0xff] }
  0xe2   : > { %v604_v30 = vld [vmem:[%s1689_s10 + $0x40] sm:$0xff]  ;;  %826 = vmatpush.msra.mxu1 %v664_v27  ;;  %877 = vmatpush.msrb.mxu2 %v701_v29  ;;  %v733_v8 = vld [vmem:[%s1689_s10 + $0x448] sm:$0xff]  ;;  %v610_v23 = vld [vmem:[%s1689_s10 + $0x70] sm:$0xff] }
  0xe3   : > { %v660_v31 = vld [vmem:[%s1689_s10 + $0x200] sm:$0xff]  ;;  %805 = vmatpush.msra.mxu0 %v604_v30  ;;  %934 = vmatpush.msrb.mxu3 %v714_v45  ;;  %v661_v9 = vld [vmem:[%s1689_s10 + $0x208] sm:$0xff]  ;;  %v674_v24 = vld [vmem:[%s1689_s10 + $0x270] sm:$0xff]  ;;  %v1287_v45 = vmov 0  }
  0xe4   : > { %v595_v33 = vld [vmem:[%s1927_s0 + $0x8] sm:$0xf]  ;;  %827 = vmatpush.msra.mxu1 %v660_v31  ;;  %878 = vmatpush.msrb.mxu2 %v697_v34  ;;  %v729_v13 = vld [vmem:[%s1689_s10 + $0x428] sm:$0xff]  ;;  %v754_v25 = vld [vmem:[%s1689_s10 + $0x4f0] sm:$0xff] }
  0xe5   : > { %770 = vst [vmem:[#allocation1 + $0x10] ss:$2 sm:$0xff] %v595_v33  ;;  %v600_v37 = vld [vmem:[%s1689_s10 + $0x20] sm:$0xff]  ;;  %935 = vmatpush.msrb.mxu3 %v710_v49  ;;  %v725_v17 = vld [vmem:[%s1689_s10 + $0x408] sm:$0xff]  ;;  %v647_v26 = vld [vmem:[%s1689_s10 + $0x198] sm:$0xff]  ;;  %1262 = vset.pattern.permute.xlu0 %v1287_v45 }
  0xe6   : > { %912 = vmatpush.msrb.mxu1 %v658_v35  ;;  %v596_v41 = vld [vmem:[%s1689_s10] sm:$0xff]  ;;  %806 = vmatpush.msra.mxu0 %v600_v37  ;;  %v606_v27 = vld [vmem:[%s1689_s10 + $0x50] sm:$0xff]  ;;  %v643_v30 = vld [vmem:[%s1689_s10 + $0x178] sm:$0xff] }
  0xe7   : > { %879 = vmatpush.msrb.mxu2 %v693_v38  ;;  %936 = vmatpush.msrb.mxu3 %v706_v53  ;;  %v1806_v12 = vld.sshfl [vmem:[#allocation1 + $0x8] sm:$0xff pattern:$0x75316420]  ;;  %v670_v28 = vld [vmem:[%s1689_s10 + $0x250] sm:$0xff]  ;;  %v639_v34 = vld [vmem:[%s1689_s10 + $0x158] sm:$0xff] }
  0xe8   : > { %913 = vmatpush.msrb.mxu1 %v654_v39  ;;  %807 = vmatpush.msra.mxu0 %v596_v41  ;;  %v750_v29 = vld [vmem:[%s1689_s10 + $0x4d0] sm:$0xff]  ;;  %v635_v38 = vld [vmem:[%s1689_s10 + $0x138] sm:$0xff] }
  0xe9   : > { %880 = vmatpush.msrb.mxu2 %v689_v43  ;;  %937 = vmatpush.msrb.mxu3 %v702_v57  ;;  %v602_v31 = vld [vmem:[%s1689_s10 + $0x30] sm:$0xff]  ;;  %v723_v39 = vld [vmem:[%s1689_s10 + $0x3f8] sm:$0xff] }
  0xea   : > { %914 = vmatpush.msrb.mxu1 %v650_v44  ;;  %1225 = vmatpush.msk.msrb.mxu0 %vm779_vm0, %v757_v46  ;;  %v666_v32 = vld [vmem:[%s1689_s10 + $0x230] sm:$0xff]  ;;  %v631_v41 = vld [vmem:[%s1689_s10 + $0x118] sm:$0xff] }
  0xeb   : > { %881 = vmatpush.msrb.mxu2 %v685_v47  ;;  %938 = vmatpush.msrb.mxu3 %v698_v62  ;;  %v746_v33 = vld [vmem:[%s1689_s10 + $0x4b0] sm:$0xff]  ;;  %v760_v43 = vld [vmem:[%s1929_s2] sm:$0xf] }
  0xec   : > { %915 = vmatpush.msrb.mxu1 %v646_v48  ;;  %900 = vmatpush.msrb.mxu0 %v753_v50  ;;  %v1783_v58 = vld.sshfl [vmem:[#allocation1 + $0x10] sm:$0xff pattern:$0x75316420]  ;;  %v598_v35 = vld [vmem:[%s1689_s10 + $0x10] sm:$0xff]  ;;  %v627_v46 = vld [vmem:[%s1689_s10 + $0xf8] sm:$0xff] }
  0xed   : > { %882 = vmatpush.msrb.mxu2 %v681_v51  ;;  %939 = vmatpush.msrb.mxu3 %v694_v2  ;;  %v662_v36 = vld [vmem:[%s1689_s10 + $0x210] sm:$0xff]  ;;  %v715_v47 = vld [vmem:[%s1689_s10 + $0x3b8] sm:$0xff] }
  0xee   : > { %916 = vmatpush.msrb.mxu1 %v642_v52  ;;  %901 = vmatpush.msrb.mxu0 %v749_v54  ;;  %v742_v37 = vld [vmem:[%s1689_s10 + $0x490] sm:$0xff]  ;;  %v759_v49 = vld [vmem:[%s1689_s10 + $0x518] sm:$0xf] }
  0xef   : > { %883 = vmatpush.msrb.mxu2 %v677_v55  ;;  %940 = vmatpush.msrb.mxu3 %v690_v6  ;;  %v738_v40 = vld [vmem:[%s1689_s10 + $0x470] sm:$0xff]  ;;  %v623_v50 = vld [vmem:[%s1689_s10 + $0xd8] sm:$0xff] }
  0xf0   : > { %917 = vmatpush.msrb.mxu1 %v638_v56  ;;  %1224 = vmatmul.msk.f32.vlgmr.msra.gmra.mxu2 %vm776_vm1, %v1783_v58  ;;  %v734_v44 = vld [vmem:[%s1689_s10 + $0x450] sm:$0xff]  ;;  %v711_v51 = vld [vmem:[%s1689_s10 + $0x398] sm:$0xff] }
  0xf1   : > { %902 = vmatpush.msrb.mxu0 %v745_v59  ;;  %884 = vmatpush.msrb.mxu2 %v673_v60  ;;  %v730_v48 = vld [vmem:[%s1689_s10 + $0x430] sm:$0xff]  ;;  %v755_v53 = vld [vmem:[%s1689_s10 + $0x4f8] sm:$0xff] }
  0xf2   : > { %918 = vmatpush.msrb.mxu1 %v634_v61  ;;  %868 = vmatmul.f32.vlgmr.msra.gmra.mxu3 %v1799_v7  ;;  %v726_v52 = vld [vmem:[%s1689_s10 + $0x410] sm:$0xff]  ;;  %v619_v54 = vld [vmem:[%s1689_s10 + $0xb8] sm:$0xff] }
  0xf3   : > { %903 = vmatpush.msrb.mxu0 %v741_v63  ;;  %885 = vmatpush.msrb.mxu2 %v669_v0  ;;  %v707_v55 = vld [vmem:[%s1689_s10 + $0x378] sm:$0xff] }
  0xf4   : > { %919 = vmatpush.msrb.mxu1 %v630_v1  ;;  %941 = vmatpush.msrb.mxu3 %v686_v11  ;;  %v751_v56 = vld [vmem:[%s1689_s10 + $0x4d8] sm:$0xff] }
  0xf5   : > { %904 = vmatpush.msrb.mxu0 %v737_v3  ;;  %886 = vmatpush.msrb.mxu2 %v665_v4  ;;  %v615_v57 = vld [vmem:[%s1689_s10 + $0x98] sm:$0xff] }
  0xf6   : > { %920 = vmatpush.msrb.mxu1 %v626_v5  ;;  %808 = vmatmul.f32.vlgmr.msra.gmra.mxu0 %v1799_v7  ;;  %v703_v59 = vld [vmem:[%s1689_s10 + $0x358] sm:$0xff] }
  0xf7   : > { %905 = vmatpush.msrb.mxu0 %v733_v8  ;;  %887 = vmatpush.msrb.mxu2 %v661_v9  ;;  %v747_v60 = vld [vmem:[%s1689_s10 + $0x4b8] sm:$0xff] }
  0xf8   : > { %921 = vmatpush.msrb.mxu1 %v622_v10  ;;  %888 = vmatmul.f32.vlgmr.msrb.gmra.mxu2 %v1806_v12  ;;  %v611_v61 = vld [vmem:[%s1689_s10 + $0x78] sm:$0xff] }
  0xf9   : > { %906 = vmatpush.msrb.mxu0 %v729_v13  ;;  %972 = vmatpush.msra.mxu2 %v659_v14  ;;  %v699_v62 = vld [vmem:[%s1689_s10 + $0x338] sm:$0xff] }
  0xfa   : > { %922 = vmatpush.msrb.mxu1 %v618_v15  ;;  %942 = vmatpush.msrb.mxu3 %v682_v16  ;;  %v743_v63 = vld [vmem:[%s1689_s10 + $0x498] sm:$0xff] }
  0xfb   : > { %907 = vmatpush.msrb.mxu0 %v725_v17  ;;  %973 = vmatpush.msra.mxu2 %v655_v18  ;;  %v607_v0 = vld [vmem:[%s1689_s10 + $0x58] sm:$0xff] }
  0xfc   : > { %923 = vmatpush.msrb.mxu1 %v614_v19  ;;  %943 = vmatpush.msrb.mxu3 %v678_v20  ;;  %v695_v1 = vld [vmem:[%s1689_s10 + $0x318] sm:$0xff] }
  0xfd   : > { %1227 = vmatpush.msk.msra.mxu0 %vm779_vm0, %v758_v21  ;;  %974 = vmatpush.msra.mxu2 %v651_v22  ;;  %v739_v2 = vld [vmem:[%s1689_s10 + $0x478] sm:$0xff] }
  0xfe   : > { %924 = vmatpush.msrb.mxu1 %v610_v23  ;;  %944 = vmatpush.msrb.mxu3 %v674_v24  ;;  %v603_v3 = vld [vmem:[%s1689_s10 + $0x38] sm:$0xff] }
  0xff   : > { %960 = vmatpush.msra.mxu0 %v754_v25  ;;  %975 = vmatpush.msra.mxu2 %v647_v26  ;;  %v691_v4 = vld [vmem:[%s1689_s10 + $0x2f8] sm:$0xff] }
 0x100   : > { %925 = vmatpush.msrb.mxu1 %v606_v27  ;;  %945 = vmatpush.msrb.mxu3 %v670_v28  ;;  %v735_v5 = vld [vmem:[%s1689_s10 + $0x458] sm:$0xff] }
 0x101   : > { %961 = vmatpush.msra.mxu0 %v750_v29  ;;  %828 = vmatmul.f32.vlgmr.msra.gmra.mxu1 %v1806_v12  ;;  %v599_v6 = vld [vmem:[%s1689_s10 + $0x18] sm:$0xff] }
 0x102   : > { %1226 = vmatmul.msk.f32.vlgmr.msrb.gmra.mxu0 %vm776_vm1, %v1783_v58  ;;  %976 = vmatpush.msra.mxu2 %v643_v30  ;;  %v687_v8 = vld [vmem:[%s1689_s10 + $0x2d8] sm:$0xff]  ;;  %v1045_v30 = vlaneseq }
 0x103   : > { %926 = vmatpush.msrb.mxu1 %v602_v31  ;;  %946 = vmatpush.msrb.mxu3 %v666_v32  ;;  %v731_v9 = vld [vmem:[%s1689_s10 + $0x438] sm:$0xff] }
 0x104   : > { %962 = vmatpush.msra.mxu0 %v746_v33  ;;  %977 = vmatpush.msra.mxu2 %v639_v34  ;;  %v683_v10 = vld [vmem:[%s1689_s10 + $0x2b8] sm:$0xff]  ;;  %v1046_v31 = vand.u32 127, %v1045_v30  ;;  %v1050_v34 = vstv %s1231_s26 }
 0x105   : > { %927 = vmatpush.msrb.mxu1 %v598_v35  ;;  %947 = vmatpush.msrb.mxu3 %v662_v36  ;;  %v727_v11 = vld [vmem:[%s1689_s10 + $0x418] sm:$0xff] }
 0x106   : > { %963 = vmatpush.msra.mxu0 %v742_v37  ;;  %948 = vmatmul.f32.vlgmr.msrb.gmra.mxu3 %v1806_v12  ;;  %v679_v13 = vld [vmem:[%s1689_s10 + $0x298] sm:$0xff]  ;;  %v1047_v33 = vadd.s32 128, %v1046_v31  ;;  %v1048_v37 = vadd.s32 256, %v1046_v31 }
 0x107   : > { %978 = vmatpush.msra.mxu2 %v635_v38  ;;  %992 = vmatpush.msra.mxu1 %v723_v39  ;;  %v675_v14 = vld [vmem:[%s1689_s10 + $0x278] sm:$0xff]  ;;  %v1051_v38 = vadd.s32 %v1050_v34, %v1046_v31 }
 0x108   : > { %964 = vmatpush.msra.mxu0 %v738_v40  ;;  %763 = vperm.xlu0 %1262, %v760_v43   ;;  %v671_v15 = vld [vmem:[%s1689_s10 + $0x258] sm:$0xff]  ;;  %v1052_v39 = vadd.s32 %v1050_v34, %v1047_v33 }
 0x109   : > { %979 = vmatpush.msra.mxu2 %v631_v41  ;;  %993 = vmatpush.msra.mxu1 %v719_v42  ;;  %v667_v16 = vld [vmem:[%s1689_s10 + $0x238] sm:$0xff]  ;;  %v1053_v42 = vadd.s32 %v1050_v34, %v1048_v37  ;;  %vm1055_vm2 = vcmp.lt.s32.totalorder %v1051_v38, 1024 }
 0x10a   : > { %965 = vmatpush.msra.mxu0 %v734_v44  ;;  %928 = vmatmul.f32.vlgmr.msrb.gmra.mxu1 %v1799_v7  ;;  %v663_v17 = vld [vmem:[%s1689_s10 + $0x218] sm:$0xff]  ;;  %vm1056_vm3 = vcmp.lt.s32.totalorder %v1052_v39, 1024  ;;  %v1049_v44 = vadd.s32 384, %v1046_v31 }
 0x10b   : > { %980 = vmatpush.msra.mxu2 %v627_v46  ;;  %994 = vmatpush.msra.mxu1 %v715_v47  ;;  %vm1057_vm4 = vcmp.lt.s32.totalorder %v1053_v42, 1024 }
 0x10c   : > { %966 = vmatpush.msra.mxu0 %v730_v48  ;;  %1229 = vmatpush.msk.msra.mxu3 %vm779_vm0, %v759_v49 }
 0x10d   : > { %981 = vmatpush.msra.mxu2 %v623_v50  ;;  %995 = vmatpush.msra.mxu1 %v711_v51  ;;  %v1054_v51 = vadd.s32 %v1050_v34, %v1049_v44 }
 0x10e   : > { %967 = vmatpush.msra.mxu0 %v726_v52  ;;  %1020 = vmatpush.msra.mxu3 %v755_v53 }
 0x10f   : > { %1228 = vmatmul.msk.f32.vlgmr.msra.gmra.mxu0 %vm776_vm1, %v1783_v58  ;;  %982 = vmatpush.msra.mxu2 %v619_v54  ;;  %vm1058_vm5 = vcmp.lt.s32.totalorder %v1054_v51, 1024 }
 0x110   : > { %996 = vmatpush.msra.mxu1 %v707_v55  ;;  %1021 = vmatpush.msra.mxu3 %v751_v56 }
 0x111   : > { %983 = vmatpush.msra.mxu2 %v615_v57 }
 0x112   : > { %997 = vmatpush.msra.mxu1 %v703_v59  ;;  %1022 = vmatpush.msra.mxu3 %v747_v60 }
 0x113   : > { %984 = vmatpush.msra.mxu2 %v611_v61 }
 0x114   : > { %998 = vmatpush.msra.mxu1 %v699_v62  ;;  %1023 = vmatpush.msra.mxu3 %v743_v63 }
 0x115   : > { %985 = vmatpush.msra.mxu2 %v607_v0 }
 0x116   : > { %999 = vmatpush.msra.mxu1 %v695_v1  ;;  %1024 = vmatpush.msra.mxu3 %v739_v2 }
 0x117   : > { %986 = vmatpush.msra.mxu2 %v603_v3 }
 0x118   : > { %1000 = vmatpush.msra.mxu1 %v691_v4  ;;  %1025 = vmatpush.msra.mxu3 %v735_v5 }
 0x119   : > { %987 = vmatpush.msra.mxu2 %v599_v6 }
 0x11a   : > { %1001 = vmatpush.msra.mxu1 %v687_v8  ;;  %988 = vmatmul.f32.vlgmr.msra.gmra.mxu2 %v1799_v7 }
 0x11b   : > { %1026 = vmatpush.msra.mxu3 %v731_v9 }
 0x11c   : > { %1002 = vmatpush.msra.mxu1 %v683_v10 }
 0x11d   : > { %1027 = vmatpush.msra.mxu3 %v727_v11 }
 0x11e   : > { %1003 = vmatpush.msra.mxu1 %v679_v13  ;;  %1230 = vmatmul.msk.f32.vlgmr.msra.gmra.mxu3 %vm776_vm1, %v1783_v58 }
 0x120   : > { %1004 = vmatpush.msra.mxu1 %v675_v14 }
 0x122   : > { %1005 = vmatpush.msra.mxu1 %v671_v15 }
 0x124   : > { %1006 = vmatpush.msra.mxu1 %v667_v16 }
 0x126   : > { %1007 = vmatpush.msra.mxu1 %v663_v17 }
 0x127   : > { %1008 = vmatmul.f32.vlgmr.msra.gmra.mxu1 %v1806_v12 }
 0x173   : > { %v849_v7 = vpop.f32.mrf.mxu2  ;;  %v809_v18 = vpop.f32.mrf.mxu0 }
 0x175   : > { %v869_v19 = vpop.f32.mrf.mxu3 }
 0x17a   : > { %v764_v20 = vpop.permute.xlu0 %763 }
 0x17b   : > { %v889_v21 = vpop.f32.mrf.mxu2  ;;  %v870_v22 = vadd.f32 %v869_v19, %v764_v20  ;;  %v810_v58 = vadd.f32 %v809_v18, %v764_v20 }
 0x17d   : > { %v890_v23 = vadd.f32 %v889_v21, %v870_v22 }
 0x17e   : > { %v829_v24 = vpop.f32.mrf.mxu1 }
 0x17f   : > { %v909_v25 = vpop.f32.mrf.mxu0  ;;  %v830_v26 = vadd.f32 %v829_v24, %v810_v58 }
 0x180   : > { %v910_v27 = vadd.f32 %v909_v25, %v890_v23 }
 0x181   : > { %v850_v28 = vadd.f32 %v849_v7, %v830_v26 }
 0x182   : > { %v1036_v12 = vrot.slane %v910_v27, 4  ;;  %v1060_v46 = vsel %vm1056_vm3, %v910_v27, 0.0 }
 0x183   : > { %v1059_v45 = vsel %vm1055_vm2, %v850_v28, 0.0  ;;  %v1075_v50 = vmul.f32 %v1060_v46, %v1060_v46  ;;  %v1064_v54 = vsel %vm779_vm0, %v1060_v46, 0.0 }
 0x184   : > { %v1038_v29 = vsel %vm779_vm0, %v850_v28, %v1036_v12  ;;  %v1074_v49 = vmul.f32 %v1059_v45, %v1059_v45  ;;  %v1063_v53 = vsel %vm779_vm0, %v1059_v45, 0.0 }
 0x185   : > { %1042 = vst [vmem:[%s1894_s24] sm:$0xff] %v1038_v29  ;;  %v1079_v62 = vsel %vm779_vm0, %v1075_v50, 0.0  ;;  %v1065_v63 = vadd.f32 %v1064_v54, %v1063_v53 }
 0x186   : > { %v1078_v61 = vsel %vm779_vm0, %v1074_v49, 0.0 }
 0x187   : > { %v929_v32 = vpop.f32.mrf.mxu1  ;;  %v1080_v5 = vadd.f32 %v1079_v62, %v1078_v61 }
 0x188   : > { %v930_v35 = vadd.f32 %v929_v32, %v764_v20 }
 0x189   : > { %v949_v36 = vpop.f32.mrf.mxu3 }
 0x18a   : > { %v950_v40 = vadd.f32 %v949_v36, %v930_v35 }
 0x18c   : > { %v969_v41 = vpop.f32.mrf.mxu0 }
 0x18d   : > { %v970_v43 = vadd.f32 %v969_v41, %v950_v40 }
 0x18f   : > { %v1061_v48 = vsel %vm1057_vm4, %v970_v43, 0.0 }
 0x190   : > { %v1076_v55 = vmul.f32 %v1061_v48, %v1061_v48  ;;  %v1066_v60 = vsel %vm779_vm0, %v1061_v48, 0.0 }
 0x191   : > { %v1067_v4 = vadd.f32 %v1066_v60, %v1065_v63 }
 0x192   : > { %v1081_v1 = vsel %vm779_vm0, %v1076_v55, 0.0 }
 0x193   : > { %v1082_v11 = vadd.f32 %v1081_v1, %v1080_v5 }
 0x19d   : > { %v989_v47 = vpop.f32.mrf.mxu2 }
 0x19e   : > { %v990_v52 = vadd.f32 %v989_v47, %v764_v20 }
 0x1a1   : > { %v1029_v57 = vpop.f32.mrf.mxu3 }
 0x1a4   : > { %v1009_v56 = vpop.f32.mrf.mxu1 }
 0x1a5   : > { %v1010_v59 = vadd.f32 %v1009_v56, %v990_v52 }
 0x1a7   : > { %v1030_v0 = vadd.f32 %v1029_v57, %v1010_v59 }
 0x1a9   : > { %v1037_v2 = vrot.slane %v1030_v0, 4  ;;  %v1062_v3 = vsel %vm1058_vm5, %v1030_v0, 0.0 }
 0x1aa   : > { %v1068_v6 = vsel %vm779_vm0, %v1062_v3, 0.0  ;;  %v1077_v8 = vmul.f32 %v1062_v3, %v1062_v3 }
 0x1ab   : > { %v1039_v9 = vsel %vm779_vm0, %v970_v43, %v1037_v2  ;;  %v1069_v10 = vadd.f32 %v1068_v6, %v1067_v4 }
 0x1ac   : > { %1043 = vst [vmem:[%s1894_s24 + $0x8] sm:$0xff] %v1039_v9  ;;  %v1083_v13 = vsel %vm779_vm0, %v1077_v8, 0.0 }
 0x1ad   : > { %1070 = vadd.xlane.f32.xlu0 %v1069_v10  ;;  %v1084_v14 = vadd.f32 %v1083_v13, %v1082_v11 }
 0x1af   : > { %1085 = vadd.xlane.f32.xlu1 %v1084_v14 }
 0x220   : > { %v1071_v15 = vpop.xlane.xlu0 %1070 }
 0x221   : > { %1073 = vst.msk [vmem:[%s589_s30] sm:$0xf] %vm1072_vm6, %v1071_v15 }
 0x222   : > { %v1086_v16 = vpop.xlane.xlu1 %1085 }
 0x223   : > { %1087 = vst.msk [vmem:[%s593_s8] sm:$0xf] %vm1072_vm6, %v1086_v16 }
 0x224 PF: > { %p13_p10 = scmp.ge.s32.totalorder %s1337_s22, 4   ;;  %s1933_s18 = smov %s1281_s19 }
 0x225   : > { %s1934_s19 = smov %s1346_s25  ;;  %s1935_s20 = smov %s1337_s22 }
 0x226   :  { %15 = sbr.rel (!%p13_p10) target bundleno = 2 (0x2), region = 115 }

// kernel: upsample_forward.6
= control target key start
LH: loop header
LB: loop body
LE: loop exit
PB: predicated region body
PF: predicated region fallthrough
CT: control target
= control target key end

     0   :  { %s824_s18 = smov 0   ;;  %s826_s19 = smov 0   ;;  %s1082_s0 = inlined_call_operand.vmem [shape: f32[4,108], index: 0, kind: input, shape index: {}]   ;;  %s1083_s1 = inlined_call_operand.vmem [shape: f32[108,1024], index: 1, kind: input, shape index: {}]   ;;  %s1084_s2 = inlined_call_operand.vmem [shape: f32[4,1], index: 2, kind: input, shape index: {}]   ;;  %s1085_s3 = inlined_call_operand.vmem [shape: f32[4,1024], index: 3, kind: output, shape index: {0}]   ;;  %s1086_s4 = inlined_call_operand.vmem [shape: f32[2,4,1], index: 4, kind: output, shape index: {1}]   ;;  %s1087_s5 = inlined_call_operand.vmem [shape: f32[2,4,1], index: 5, kind: output, shape index: {2}]  }
   0x1   :  { %s828_s20 = smov 0  }
   0x2 LB: > { %s840_s21 = sadd.s32 4294967295, %s791_s20   ;;  %s843_s22 = sadd.s32 1, %s791_s20   ;;  %s791_s20 = sphi %s828_s20, %s1090_s20   ;;  %s787_s19 = sphi %s826_s19, %s1089_s19   ;;  %s783_s18 = sphi %s824_s18, %s1088_s18  }
   0x3   : > { %s41_s23 = ssub.s32 %s791_s20, %s843_s22  ;;  %s44_s24 = sadd.s32 1, %s787_s19 }
   0x4   : > { %p42_p0 = scmp.eq.s32.totalorder %s41_s23, 0  ;;  %p51_p1 = scmp.ne.s32.totalorder %s787_s19, %s783_s18 }
   0x5   : > { %p52_p2 = scmp.eq.s32.totalorder %s791_s20, 0  ;;  %p721_p4 = scmp.ge.s32.totalorder %s791_s20, 2 }
   0x6   : > { %s852_s25 = scalar_select %p42_p0, %s787_s19, %s44_s24  }
   0x7   : > { %p53_p3 = por %p52_p2, %p51_p1  ;;  %182 = sbr.rel (%p721_p4) target bundleno = 72 (0x48), region = 24 }
   0xc   : > { %185 = sbr.rel (!%p53_p3) target bundleno = 72 (0x48), region = 28  ;;  %s187_s26 = sand.u32 (%p53_p3), 1, %s787_s19  }
   0xd   : > { %s740_s27 = sshll.u32 (%p53_p3), %s791_s20, 5  ;;  %s741_s28 = smul.u32 (%p53_p3), 448, %s187_s26 }
   0xe   : > { %s860_s6 = scalar_lea.vmem (%p53_p3), %s1083_s1, %s740_s27 }
   0xf   : > { %v205_v0 = vld [vmem:[%s860_s6] sm:$0xff] (%p53_p3)  ;;  %v207_v1 = vld [vmem:[%s860_s6 + $0x8] sm:$0xff] (%p53_p3)  ;;  %v209_v2 = vld [vmem:[%s860_s6 + $0x10] sm:$0xff] (%p53_p3)  ;;  %s865_s7 = scalar_lea.vmem (%p53_p3), [#allocation2], %s741_s28 }
  0x10   : > { %206 = vst [vmem:[%s865_s7] sm:$0xff] (%p53_p3), %v205_v0  ;;  %v211_v3 = vld [vmem:[%s860_s6 + $0x18] sm:$0xff] (%p53_p3)  ;;  %v213_v4 = vld [vmem:[%s860_s6 + $0x40] sm:$0xff] (%p53_p3)  ;;  %v215_v5 = vld [vmem:[%s860_s6 + $0x48] sm:$0xff] (%p53_p3) }
  0x11   : > { %208 = vst [vmem:[%s865_s7 + $0x8] sm:$0xff] %v207_v1  ;;  %v217_v6 = vld [vmem:[%s860_s6 + $0x50] sm:$0xff]  ;;  %v219_v7 = vld [vmem:[%s860_s6 + $0x58] sm:$0xff]  ;;  %v221_v8 = vld [vmem:[%s860_s6 + $0x80] sm:$0xff] }
  0x12   : > { %210 = vst [vmem:[%s865_s7 + $0x10] sm:$0xff] %v209_v2  ;;  %v223_v9 = vld [vmem:[%s860_s6 + $0x88] sm:$0xff]  ;;  %v225_v10 = vld [vmem:[%s860_s6 + $0x90] sm:$0xff]  ;;  %v227_v11 = vld [vmem:[%s860_s6 + $0x98] sm:$0xff] }
  0x13   : > { %212 = vst [vmem:[%s865_s7 + $0x18] sm:$0xff] %v211_v3  ;;  %v229_v12 = vld [vmem:[%s860_s6 + $0xc0] sm:$0xff]  ;;  %v231_v13 = vld [vmem:[%s860_s6 + $0xc8] sm:$0xff]  ;;  %v233_v14 = vld [vmem:[%s860_s6 + $0xd0] sm:$0xff] }
  0x14   : > { %214 = vst [vmem:[%s865_s7 + $0x20] sm:$0xff] %v213_v4  ;;  %v235_v15 = vld [vmem:[%s860_s6 + $0xd8] sm:$0xff]  ;;  %v237_v16 = vld [vmem:[%s860_s6 + $0x100] sm:$0xff]  ;;  %v239_v17 = vld [vmem:[%s860_s6 + $0x108] sm:$0xff] }
  0x15   : > { %216 = vst [vmem:[%s865_s7 + $0x28] sm:$0xff] %v215_v5  ;;  %v241_v18 = vld [vmem:[%s860_s6 + $0x110] sm:$0xff]  ;;  %v243_v19 = vld [vmem:[%s860_s6 + $0x118] sm:$0xff]  ;;  %v245_v20 = vld [vmem:[%s860_s6 + $0x140] sm:$0xff] }
  0x16   : > { %218 = vst [vmem:[%s865_s7 + $0x30] sm:$0xff] %v217_v6  ;;  %v247_v21 = vld [vmem:[%s860_s6 + $0x148] sm:$0xff]  ;;  %v249_v22 = vld [vmem:[%s860_s6 + $0x150] sm:$0xff]  ;;  %v251_v23 = vld [vmem:[%s860_s6 + $0x158] sm:$0xff] }
  0x17   : > { %220 = vst [vmem:[%s865_s7 + $0x38] sm:$0xff] %v219_v7  ;;  %v253_v24 = vld [vmem:[%s860_s6 + $0x180] sm:$0xff]  ;;  %v255_v25 = vld [vmem:[%s860_s6 + $0x188] sm:$0xff]  ;;  %v257_v26 = vld [vmem:[%s860_s6 + $0x190] sm:$0xff] }
  0x18   : > { %222 = vst [vmem:[%s865_s7 + $0x40] sm:$0xff] %v221_v8  ;;  %v259_v27 = vld [vmem:[%s860_s6 + $0x198] sm:$0xff]  ;;  %v261_v28 = vld [vmem:[%s860_s6 + $0x1c0] sm:$0xff]  ;;  %v263_v29 = vld [vmem:[%s860_s6 + $0x1c8] sm:$0xff] }
  0x19   : > { %224 = vst [vmem:[%s865_s7 + $0x48] sm:$0xff] %v223_v9  ;;  %v265_v30 = vld [vmem:[%s860_s6 + $0x1d0] sm:$0xff]  ;;  %v267_v31 = vld [vmem:[%s860_s6 + $0x1d8] sm:$0xff]  ;;  %v269_v32 = vld [vmem:[%s860_s6 + $0x200] sm:$0xff] }
  0x1a   : > { %226 = vst [vmem:[%s865_s7 + $0x50] sm:$0xff] %v225_v10  ;;  %v271_v33 = vld [vmem:[%s860_s6 + $0x208] sm:$0xff]  ;;  %v273_v34 = vld [vmem:[%s860_s6 + $0x210] sm:$0xff]  ;;  %v275_v35 = vld [vmem:[%s860_s6 + $0x218] sm:$0xff] }
  0x1b   : > { %228 = vst [vmem:[%s865_s7 + $0x58] sm:$0xff] %v227_v11  ;;  %v277_v36 = vld [vmem:[%s860_s6 + $0x240] sm:$0xff]  ;;  %v279_v37 = vld [vmem:[%s860_s6 + $0x248] sm:$0xff]  ;;  %v281_v38 = vld [vmem:[%s860_s6 + $0x250] sm:$0xff] }
  0x1c   : > { %230 = vst [vmem:[%s865_s7 + $0x60] sm:$0xff] %v229_v12  ;;  %v283_v39 = vld [vmem:[%s860_s6 + $0x258] sm:$0xff]  ;;  %v285_v40 = vld [vmem:[%s860_s6 + $0x280] sm:$0xff]  ;;  %v287_v41 = vld [vmem:[%s860_s6 + $0x288] sm:$0xff] }
  0x1d   : > { %232 = vst [vmem:[%s865_s7 + $0x68] sm:$0xff] %v231_v13  ;;  %v289_v42 = vld [vmem:[%s860_s6 + $0x290] sm:$0xff]  ;;  %v291_v43 = vld [vmem:[%s860_s6 + $0x298] sm:$0xff]  ;;  %v293_v44 = vld [vmem:[%s860_s6 + $0x2c0] sm:$0xff] }
  0x1e   : > { %234 = vst [vmem:[%s865_s7 + $0x70] sm:$0xff] %v233_v14  ;;  %v295_v45 = vld [vmem:[%s860_s6 + $0x2c8] sm:$0xff]  ;;  %v297_v46 = vld [vmem:[%s860_s6 + $0x2d0] sm:$0xff]  ;;  %v299_v47 = vld [vmem:[%s860_s6 + $0x2d8] sm:$0xff] }
  0x1f   : > { %236 = vst [vmem:[%s865_s7 + $0x78] sm:$0xff] %v235_v15  ;;  %v301_v48 = vld [vmem:[%s860_s6 + $0x300] sm:$0xff]  ;;  %v303_v49 = vld [vmem:[%s860_s6 + $0x308] sm:$0xff]  ;;  %v305_v50 = vld [vmem:[%s860_s6 + $0x310] sm:$0xff] }
  0x20   : > { %238 = vst [vmem:[%s865_s7 + $0x80] sm:$0xff] %v237_v16  ;;  %v307_v51 = vld [vmem:[%s860_s6 + $0x318] sm:$0xff]  ;;  %v309_v52 = vld [vmem:[%s860_s6 + $0x340] sm:$0xff]  ;;  %v311_v53 = vld [vmem:[%s860_s6 + $0x348] sm:$0xff] }
  0x21   : > { %240 = vst [vmem:[%s865_s7 + $0x88] sm:$0xff] %v239_v17  ;;  %v313_v54 = vld [vmem:[%s860_s6 + $0x350] sm:$0xff]  ;;  %v315_v55 = vld [vmem:[%s860_s6 + $0x358] sm:$0xff] }
  0x22   : > { %242 = vst [vmem:[%s865_s7 + $0x90] sm:$0xff] %v241_v18 }
  0x23   : > { %244 = vst [vmem:[%s865_s7 + $0x98] sm:$0xff] %v243_v19 }
  0x24   : > { %246 = vst [vmem:[%s865_s7 + $0xa0] sm:$0xff] %v245_v20 }
  0x25   : > { %248 = vst [vmem:[%s865_s7 + $0xa8] sm:$0xff] %v247_v21 }
  0x26   : > { %250 = vst [vmem:[%s865_s7 + $0xb0] sm:$0xff] %v249_v22 }
  0x27   : > { %252 = vst [vmem:[%s865_s7 + $0xb8] sm:$0xff] %v251_v23 }
  0x28   : > { %254 = vst [vmem:[%s865_s7 + $0xc0] sm:$0xff] %v253_v24 }
  0x29   : > { %256 = vst [vmem:[%s865_s7 + $0xc8] sm:$0xff] %v255_v25 }
  0x2a   : > { %258 = vst [vmem:[%s865_s7 + $0xd0] sm:$0xff] %v257_v26 }
  0x2b   : > { %260 = vst [vmem:[%s865_s7 + $0xd8] sm:$0xff] %v259_v27 }
  0x2c   : > { %262 = vst [vmem:[%s865_s7 + $0xe0] sm:$0xff] %v261_v28 }
  0x2d   : > { %264 = vst [vmem:[%s865_s7 + $0xe8] sm:$0xff] %v263_v29 }
  0x2e   : > { %266 = vst [vmem:[%s865_s7 + $0xf0] sm:$0xff] %v265_v30 }
  0x2f   : > { %268 = vst [vmem:[%s865_s7 + $0xf8] sm:$0xff] %v267_v31 }
  0x30   : > { %270 = vst [vmem:[%s865_s7 + $0x100] sm:$0xff] %v269_v32 }
  0x31   : > { %272 = vst [vmem:[%s865_s7 + $0x108] sm:$0xff] %v271_v33 }
  0x32   : > { %274 = vst [vmem:[%s865_s7 + $0x110] sm:$0xff] %v273_v34 }
  0x33   : > { %276 = vst [vmem:[%s865_s7 + $0x118] sm:$0xff] %v275_v35 }
  0x34   : > { %278 = vst [vmem:[%s865_s7 + $0x120] sm:$0xff] %v277_v36 }
  0x35   : > { %280 = vst [vmem:[%s865_s7 + $0x128] sm:$0xff] %v279_v37 }
  0x36   : > { %282 = vst [vmem:[%s865_s7 + $0x130] sm:$0xff] %v281_v38 }
  0x37   : > { %284 = vst [vmem:[%s865_s7 + $0x138] sm:$0xff] %v283_v39 }
  0x38   : > { %286 = vst [vmem:[%s865_s7 + $0x140] sm:$0xff] %v285_v40 }
  0x39   : > { %288 = vst [vmem:[%s865_s7 + $0x148] sm:$0xff] %v287_v41 }
  0x3a   : > { %290 = vst [vmem:[%s865_s7 + $0x150] sm:$0xff] %v289_v42 }
  0x3b   : > { %292 = vst [vmem:[%s865_s7 + $0x158] sm:$0xff] %v291_v43 }
  0x3c   : > { %294 = vst [vmem:[%s865_s7 + $0x160] sm:$0xff] %v293_v44 }
  0x3d   : > { %296 = vst [vmem:[%s865_s7 + $0x168] sm:$0xff] %v295_v45 }
  0x3e   : > { %298 = vst [vmem:[%s865_s7 + $0x170] sm:$0xff] %v297_v46 }
  0x3f   : > { %300 = vst [vmem:[%s865_s7 + $0x178] sm:$0xff] %v299_v47 }
  0x40   : > { %302 = vst [vmem:[%s865_s7 + $0x180] sm:$0xff] %v301_v48 }
  0x41   : > { %304 = vst [vmem:[%s865_s7 + $0x188] sm:$0xff] %v303_v49 }
  0x42   : > { %306 = vst [vmem:[%s865_s7 + $0x190] sm:$0xff] %v305_v50 }
  0x43   : > { %308 = vst [vmem:[%s865_s7 + $0x198] sm:$0xff] %v307_v51 }
  0x44   : > { %310 = vst [vmem:[%s865_s7 + $0x1a0] sm:$0xff] %v309_v52 }
  0x45   : > { %312 = vst [vmem:[%s865_s7 + $0x1a8] sm:$0xff] %v311_v53 }
  0x46   : > { %314 = vst [vmem:[%s865_s7 + $0x1b0] sm:$0xff] %v313_v54 }
  0x47   : > { %316 = vst [vmem:[%s865_s7 + $0x1b8] sm:$0xff] %v315_v55 }
  0x48 PF: > { %p724_p5 = scmp.ge.s32.totalorder %s791_s20, 1  ;;  %p321_p6 = scmp.lt.s32.totalorder %s791_s20, 3 }
  0x4a   : > { %p322_p7 = pnand %p724_p5, %p321_p6 }
  0x4b   : > { %s328_s8 = sand.u32 (!%p322_p7), 1, %s783_s18   ;;  %s725_s15 = sshll.u32 (!%p322_p7), %s840_s21, 2 }
  0x4c   : > { %325 = sbr.rel (%p322_p7) target bundleno = 369 (0x171), region = 51  ;;  %s737_s16 = sshll.u32 (!%p322_p7), %s840_s21, 9 }
  0x4d   : > { %s742_s9 = smul.u32 (!%p322_p7), 448, %s328_s8  ;;  %p365_p8 = scmp.lt.s32.totalorder (!%p322_p7), %s725_s15, 7 }
  0x4e   : > { %p370_p9 = scmp.lt.s32.totalorder (!%p322_p7), %s840_s21, 1 }
  0x4f   : > { %s982_s12 = scalar_lea.vmem (!%p322_p7), [#allocation2], %s742_s9 }
  0x51   : > { %vm445_vm0 = vcmask 1043456   ;;  %v435_v56 = vld [vmem:[%s1084_s2] sm:$0xf]  ;;  %v793_v57 = vmov 0   ;;  %v433_v58 = vld [vmem:[%s982_s12 + $0x1b0] sm:$0xf]  ;;  %v551_v51 = vlaneseq  ;;  %v556_v54 = vstv %s737_s16 }
  0x52   : > { %768 = vset.pattern.permute.xlu0 %v793_v57  ;;  %v434_v59 = vld [vmem:[%s982_s12 + $0x1b8] sm:$0xf]  ;;  %v432_v60 = vld [vmem:[%s982_s12 + $0x1a8] sm:$0xf]  ;;  %733 = vmatpush.msk.msra.mxu2 %vm445_vm0, %v433_v58  ;;  %v429_v61 = vld [vmem:[%s982_s12 + $0x190] sm:$0xff]  ;;  %vm441_vm1 = vcmask 883712  }
  0x53   : > { %438 = vperm.xlu0 %768, %v435_v56   ;;  %735 = vmatpush.msk.msra.mxu3 %vm445_vm0, %v434_v59  ;;  %v430_v62 = vld [vmem:[%s982_s12 + $0x198] sm:$0xff]  ;;  %v431_v63 = vld [vmem:[%s982_s12 + $0x1a0] sm:$0xf]  ;;  %v428_v0 = vld [vmem:[%s982_s12 + $0x188] sm:$0xff]  ;;  %v552_v52 = vand.u32 127, %v551_v51  ;;  %s1092_s15 = smov (!%p365_p8, %s725_s15), 7 }
  0x54   : > { %731 = vmatpush.msk.msra.mxu1 %vm445_vm0, %v432_v60  ;;  %729 = vmatpush.msk.msra.mxu0 %vm445_vm0, %v431_v63  ;;  %v425_v1 = vld [vmem:[%s982_s12 + $0x170] sm:$0xff]  ;;  %v426_v2 = vld [vmem:[%s982_s12 + $0x178] sm:$0xff]  ;;  %v427_v3 = vld [vmem:[%s982_s12 + $0x180] sm:$0xff]  ;;  %s726_s17 = sshll.u32 %s1092_s15, 2  ;;  %s1094_s21 = smov (!%p370_p9, %s840_s21), 1  ;;  %vm578_vm6 = vcmask 3072  }
  0x55   : > { %501 = vmatpush.msra.mxu2 %v429_v61  ;;  %521 = vmatpush.msra.mxu3 %v430_v62  ;;  %v424_v4 = vld [vmem:[%s982_s12 + $0x168] sm:$0xff]  ;;  %v421_v5 = vld [vmem:[%s982_s12 + $0x150] sm:$0xff]  ;;  %v422_v6 = vld [vmem:[%s982_s12 + $0x158] sm:$0xff]  ;;  %v553_v53 = vadd.s32 128, %v552_v52  ;;  %v554_v55 = vadd.s32 256, %v552_v52  ;;  %v555_v56 = vadd.s32 384, %v552_v52  ;;  %v557_v58 = vadd.s32 %v556_v54, %v552_v52  ;;  %s368_s23 = scalar_lea.vmem %s1085_s3, %s726_s17 }
  0x56   : > { %481 = vmatpush.msra.mxu1 %v428_v0  ;;  %461 = vmatpush.msra.mxu0 %v427_v3  ;;  %v423_v7 = vld [vmem:[%s982_s12 + $0x160] sm:$0xff]  ;;  %v420_v8 = vld [vmem:[%s982_s12 + $0x148] sm:$0xff]  ;;  %v417_v10 = vld [vmem:[%s982_s12 + $0x130] sm:$0xff]  ;;  %s727_s24 = sshll.u32 %s1094_s21, 2 }
  0x57   : > { %502 = vmatpush.msra.mxu2 %v425_v1  ;;  %522 = vmatpush.msra.mxu3 %v426_v2  ;;  %v419_v9 = vld [vmem:[%s982_s12 + $0x140] sm:$0xff]  ;;  %v418_v11 = vld [vmem:[%s982_s12 + $0x138] sm:$0xff]  ;;  %v416_v12 = vld [vmem:[%s982_s12 + $0x128] sm:$0xff]  ;;  %v558_v57 = vadd.s32 %v556_v54, %v553_v53  ;;  %v559_v60 = vadd.s32 %v556_v54, %v554_v55  ;;  %v560_v61 = vadd.s32 %v556_v54, %v555_v56  ;;  %vm561_vm3 = vcmp.lt.s32.totalorder %v557_v58, 1024  ;;  %s373_s28 = scalar_lea.vmem %s1086_s4, %s727_s24  ;;  %s377_s6 = scalar_lea.vmem %s1087_s5, %s727_s24 }
  0x58   : > { %482 = vmatpush.msra.mxu1 %v424_v4  ;;  %462 = vmatpush.msra.mxu0 %v423_v7  ;;  %v415_v13 = vld [vmem:[%s982_s12 + $0x120] sm:$0xff]  ;;  %v413_v14 = vld [vmem:[%s982_s12 + $0x110] sm:$0xff]  ;;  %v414_v15 = vld [vmem:[%s982_s12 + $0x118] sm:$0xff] }
  0x59   : > { %503 = vmatpush.msra.mxu2 %v421_v5  ;;  %523 = vmatpush.msra.mxu3 %v422_v6  ;;  %v412_v16 = vld [vmem:[%s982_s12 + $0x108] sm:$0xff]  ;;  %v411_v17 = vld [vmem:[%s982_s12 + $0x100] sm:$0xff]  ;;  %v409_v18 = vld [vmem:[%s982_s12 + $0xf0] sm:$0xff]  ;;  %vm562_vm2 = vcmp.lt.s32.totalorder %v558_v57, 1024  ;;  %vm563_vm4 = vcmp.lt.s32.totalorder %v559_v60, 1024  ;;  %vm564_vm5 = vcmp.lt.s32.totalorder %v560_v61, 1024 }
  0x5a   : > { %483 = vmatpush.msra.mxu1 %v420_v8  ;;  %463 = vmatpush.msra.mxu0 %v419_v9  ;;  %v410_v19 = vld [vmem:[%s982_s12 + $0xf8] sm:$0xff]  ;;  %v408_v20 = vld [vmem:[%s982_s12 + $0xe8] sm:$0xff]  ;;  %v407_v21 = vld [vmem:[%s982_s12 + $0xe0] sm:$0xff] }
  0x5b   : > { %504 = vmatpush.msra.mxu2 %v417_v10  ;;  %524 = vmatpush.msra.mxu3 %v418_v11  ;;  %v405_v22 = vld [vmem:[%s982_s12 + $0xd0] sm:$0xff]  ;;  %v406_v23 = vld [vmem:[%s982_s12 + $0xd8] sm:$0xff]  ;;  %v404_v24 = vld [vmem:[%s982_s12 + $0xc8] sm:$0xff] }
  0x5c   : > { %484 = vmatpush.msra.mxu1 %v416_v12  ;;  %464 = vmatpush.msra.mxu0 %v415_v13  ;;  %v403_v25 = vld [vmem:[%s982_s12 + $0xc0] sm:$0xff]  ;;  %v401_v26 = vld [vmem:[%s982_s12 + $0xb0] sm:$0xff]  ;;  %v402_v27 = vld [vmem:[%s982_s12 + $0xb8] sm:$0xff] }
  0x5d   : > { %505 = vmatpush.msra.mxu2 %v413_v14  ;;  %525 = vmatpush.msra.mxu3 %v414_v15  ;;  %v400_v28 = vld [vmem:[%s982_s12 + $0xa8] sm:$0xff]  ;;  %v399_v29 = vld [vmem:[%s982_s12 + $0xa0] sm:$0xff]  ;;  %v397_v30 = vld [vmem:[%s982_s12 + $0x90] sm:$0xff] }
  0x5e   : > { %485 = vmatpush.msra.mxu1 %v412_v16  ;;  %465 = vmatpush.msra.mxu0 %v411_v17  ;;  %v398_v31 = vld [vmem:[%s982_s12 + $0x98] sm:$0xff]  ;;  %v396_v32 = vld [vmem:[%s982_s12 + $0x88] sm:$0xff]  ;;  %v395_v33 = vld [vmem:[%s982_s12 + $0x80] sm:$0xff] }
  0x5f   : > { %506 = vmatpush.msra.mxu2 %v409_v18  ;;  %526 = vmatpush.msra.mxu3 %v410_v19  ;;  %v393_v34 = vld [vmem:[%s982_s12 + $0x70] sm:$0xff]  ;;  %v394_v35 = vld [vmem:[%s982_s12 + $0x78] sm:$0xff]  ;;  %v392_v36 = vld [vmem:[%s982_s12 + $0x68] sm:$0xff] }
  0x60   : > { %486 = vmatpush.msra.mxu1 %v408_v20  ;;  %466 = vmatpush.msra.mxu0 %v407_v21  ;;  %v391_v37 = vld [vmem:[%s982_s12 + $0x60] sm:$0xff]  ;;  %v389_v38 = vld [vmem:[%s982_s12 + $0x50] sm:$0xff]  ;;  %v390_v39 = vld [vmem:[%s982_s12 + $0x58] sm:$0xff] }
  0x61   : > { %507 = vmatpush.msra.mxu2 %v405_v22  ;;  %527 = vmatpush.msra.mxu3 %v406_v23  ;;  %v388_v40 = vld [vmem:[%s982_s12 + $0x48] sm:$0xff]  ;;  %v387_v41 = vld [vmem:[%s982_s12 + $0x40] sm:$0xff]  ;;  %v385_v42 = vld [vmem:[%s982_s12 + $0x30] sm:$0xff] }
  0x62   : > { %487 = vmatpush.msra.mxu1 %v404_v24  ;;  %467 = vmatpush.msra.mxu0 %v403_v25  ;;  %v386_v43 = vld [vmem:[%s982_s12 + $0x38] sm:$0xff]  ;;  %v384_v44 = vld [vmem:[%s982_s12 + $0x28] sm:$0xff]  ;;  %v383_v45 = vld [vmem:[%s982_s12 + $0x20] sm:$0xff] }
  0x63   : > { %508 = vmatpush.msra.mxu2 %v401_v26  ;;  %528 = vmatpush.msra.mxu3 %v402_v27  ;;  %v381_v46 = vld [vmem:[%s982_s12 + $0x10] sm:$0xff]  ;;  %v382_v47 = vld [vmem:[%s982_s12 + $0x18] sm:$0xff]  ;;  %v378_v48 = vld [vmem:[%s1082_s0] sm:$0xf] }
  0x64   : > { %488 = vmatpush.msra.mxu1 %v400_v28  ;;  %468 = vmatpush.msra.mxu0 %v399_v29  ;;  %v380_v49 = vld [vmem:[%s982_s12 + $0x8] sm:$0xff]  ;;  %v379_v50 = vld [vmem:[%s982_s12] sm:$0xff] }
  0x65   : > { %509 = vmatpush.msra.mxu2 %v397_v30  ;;  %529 = vmatpush.msra.mxu3 %v398_v31 }
  0x66   : > { %489 = vmatpush.msra.mxu1 %v396_v32  ;;  %469 = vmatpush.msra.mxu0 %v395_v33 }
  0x67   : > { %510 = vmatpush.msra.mxu2 %v393_v34  ;;  %530 = vmatpush.msra.mxu3 %v394_v35 }
  0x68   : > { %490 = vmatpush.msra.mxu1 %v392_v36  ;;  %470 = vmatpush.msra.mxu0 %v391_v37 }
  0x69   : > { %511 = vmatpush.msra.mxu2 %v389_v38  ;;  %531 = vmatpush.msra.mxu3 %v390_v39 }
  0x6a   : > { %491 = vmatpush.msra.mxu1 %v388_v40  ;;  %471 = vmatpush.msra.mxu0 %v387_v41 }
  0x6b   : > { %512 = vmatpush.msra.mxu2 %v385_v42  ;;  %532 = vmatpush.msra.mxu3 %v386_v43 }
  0x6c   : > { %492 = vmatpush.msra.mxu1 %v384_v44  ;;  %472 = vmatpush.msra.mxu0 %v383_v45 }
  0x6d   : > { %513 = vmatpush.msra.mxu2 %v381_v46  ;;  %533 = vmatpush.msra.mxu3 %v382_v47 }
  0x6e   : > { %734 = vmatmul.msk.f32.vlgmr.msra.gmra.mxu2 %vm441_vm1, %v378_v48  ;;  %736 = vmatmul.msk.f32.vlgmr.msra.gmra.mxu3 %vm441_vm1, %v378_v48 }
  0x6f   : > { %493 = vmatpush.msra.mxu1 %v380_v49  ;;  %473 = vmatpush.msra.mxu0 %v379_v50 }
  0x70   : > { %732 = vmatmul.msk.f32.vlgmr.msra.gmra.mxu1 %vm441_vm1, %v378_v48  ;;  %730 = vmatmul.msk.f32.vlgmr.msra.gmra.mxu0 %vm441_vm1, %v378_v48 }
  0xc5   : > { %v439_v59 = vpop.permute.xlu0 %438 }
  0xed   : > { %v495_v62 = vpop.f32.mrf.mxu1  ;;  %v475_v63 = vpop.f32.mrf.mxu0 }
  0xee   : > { %v496_v0 = vadd.f32 %v495_v62, %v439_v59  ;;  %v476_v1 = vadd.f32 %v475_v63, %v439_v59 }
  0xf0   : > { %v542_v2 = vrot.slane %v496_v0, 4  ;;  %v566_v3 = vsel %vm562_vm2, %v496_v0, 0.0  ;;  %v565_v4 = vsel %vm561_vm3, %v476_v1, 0.0 }
  0xf1   : > { %v570_v5 = vsel %vm445_vm0, %v566_v3, 0.0  ;;  %v581_v6 = vmul.f32 %v566_v3, %v566_v3  ;;  %v569_v7 = vsel %vm445_vm0, %v565_v4, 0.0  ;;  %v580_v8 = vmul.f32 %v565_v4, %v565_v4  ;;  %v515_v9 = vpop.f32.mrf.mxu2  ;;  %v535_v10 = vpop.f32.mrf.mxu3 }
  0xf2   : > { %v544_v11 = vsel %vm445_vm0, %v476_v1, %v542_v2  ;;  %v571_v12 = vadd.f32 %v570_v5, %v569_v7  ;;  %v516_v13 = vadd.f32 %v515_v9, %v439_v59  ;;  %v536_v14 = vadd.f32 %v535_v10, %v439_v59 }
  0xf3   : > { %548 = vst [vmem:[%s368_s23] sm:$0xff] %v544_v11  ;;  %v584_v15 = vsel %vm445_vm0, %v580_v8, 0.0  ;;  %v585_v16 = vsel %vm445_vm0, %v581_v6, 0.0 }
  0xf4   : > { %v567_v17 = vsel %vm563_vm4, %v516_v13, 0.0  ;;  %v543_v18 = vrot.slane %v536_v14, 4  ;;  %v568_v19 = vsel %vm564_vm5, %v536_v14, 0.0  ;;  %v586_v20 = vadd.f32 %v585_v16, %v584_v15 }
  0xf5   : > { %v572_v21 = vsel %vm445_vm0, %v567_v17, 0.0  ;;  %v582_v22 = vmul.f32 %v567_v17, %v567_v17  ;;  %v583_v23 = vmul.f32 %v568_v19, %v568_v19  ;;  %v574_v26 = vsel %vm445_vm0, %v568_v19, 0.0 }
  0xf6   : > { %v545_v24 = vsel %vm445_vm0, %v516_v13, %v543_v18  ;;  %v573_v25 = vadd.f32 %v572_v21, %v571_v12 }
  0xf7   : > { %549 = vst [vmem:[%s368_s23 + $0x8] sm:$0xff] %v545_v24  ;;  %v587_v27 = vsel %vm445_vm0, %v582_v22, 0.0  ;;  %v589_v30 = vsel %vm445_vm0, %v583_v23, 0.0 }
  0xf8   : > { %v575_v28 = vadd.f32 %v574_v26, %v573_v25  ;;  %v588_v29 = vadd.f32 %v587_v27, %v586_v20 }
  0xfa   : > { %576 = vadd.xlane.f32.xlu0 %v575_v28  ;;  %v590_v31 = vadd.f32 %v589_v30, %v588_v29 }
  0xfc   : > { %591 = vadd.xlane.f32.xlu1 %v590_v31 }
 0x16d   : > { %v577_v32 = vpop.xlane.xlu0 %576 }
 0x16e   : > { %579 = vst.msk [vmem:[%s373_s28] sm:$0xf] %vm578_vm6, %v577_v32 }
 0x16f   : > { %v592_v33 = vpop.xlane.xlu1 %591 }
 0x170   : > { %593 = vst.msk [vmem:[%s377_s6] sm:$0xf] %vm578_vm6, %v592_v33 }
 0x171 PF: > { %p13_p10 = scmp.ge.s32.totalorder %s843_s22, 4   ;;  %s1088_s18 = smov %s787_s19 }
 0x172   : > { %s1089_s19 = smov %s852_s25  ;;  %s1090_s20 = smov %s843_s22 }
 0x173   :  { %15 = sbr.rel (!%p13_p10) target bundleno = 2 (0x2), region = 114 }

// kernel: upsample_forward.7
= control target key start
LH: loop header
LB: loop body
LE: loop exit
PB: predicated region body
PF: predicated region fallthrough
CT: control target
= control target key end

     0   :  { %s312_s12 = smov 0   ;;  %s335_s0 = inlined_call_operand.vmem [shape: f32[4,1024], index: 0, kind: input, shape index: {}]   ;;  %s336_s1 = inlined_call_operand.vmem [shape: f32[4,1], index: 1, kind: input, shape index: {}]   ;;  %s337_s2 = inlined_call_operand.vmem [shape: f32[4,1], index: 2, kind: input, shape index: {}]   ;;  %s338_s3 = inlined_call_operand.vmem [shape: f32[4,1024], index: 3, kind: output, shape index: {}]  }
   0x1 LB: > { %s260_s13 = sadd.s32 4294967295, %s288_s12   ;;  %p264_p0 = scmp.ge.s32.totalorder %s288_s12, 1  ;;  %s288_s12 = sphi %s312_s12, %s13_s12  }
   0x2   : > { %p138_p1 = scmp.lt.s32.totalorder %s288_s12, 3 }
   0x4   : > { %p139_p2 = pnand %p264_p0, %p138_p1 }
   0x5   : > { %s265_s18 = sshll.u32 (!%p139_p2), %s260_s13, 2 }
   0x6   : > { %142 = sbr.rel (%p139_p2) target bundleno = 144 (0x90), region = 32  ;;  %p163_p3 = scmp.lt.s32.totalorder (!%p139_p2), %s265_s18, 7 }
   0xb   : > { %v176_v0 = vld [vmem:[%s336_s1] sm:$0xf]  ;;  %v290_v1 = vmov 0   ;;  %s340_s18 = smov (!%p163_p3, %s265_s18), 7  ;;  %v291_v3 = vmov 839922192  }
   0xc   : > { %281 = vset.pattern.permute.xlu0 %v290_v1  ;;  %v188_v2 = vld [vmem:[%s337_s2] sm:$0xf]  ;;  %v182_v4 = vunpack.c.l.s4 %v291_v3  ;;  %s266_s19 = sshll.u32 %s340_s18, 2 }
   0xd   : > { %179 = vperm.xlu0 %281, %v176_v0   ;;  %s166_s22 = scalar_lea.vmem %s335_s0, %s266_s19  ;;  %s172_s25 = scalar_lea.vmem %s338_s3, %s266_s19 }
   0xe   : > { %v183_v6 = vunpack.c.0.s8 %v182_v4  ;;  %v174_v8 = vld [vmem:[%s166_s22] sm:$0xff]  ;;  %v175_v9 = vld [vmem:[%s166_s22 + $0x8] sm:$0xff] }
  0x15   : > { %191 = vperm.xlu0 %281, %v188_v2  }
  0x7f   : > { %v180_v5 = vpop.permute.xlu0 %179 }
  0x80   : > { %v184_v7 = vperm.slane %v180_v5, %v183_v6 }
  0x82   : > { %v186_v11 = vmul.f32 %v184_v7, %v174_v8  ;;  %v187_v12 = vmul.f32 %v184_v7, %v175_v9 }
  0x87   : > { %v192_v10 = vpop.permute.xlu0 %191 }
  0x88   : > { %v196_v13 = vperm.slane %v192_v10, %v183_v6 }
  0x8a   : > { %v198_v14 = vadd.f32 %v196_v13, %v186_v11  ;;  %v199_v15 = vadd.f32 %v196_v13, %v187_v12 }
  0x8c   : > { %v200_v16 = vmax.f32 %v198_v14, 0.0  ;;  %v201_v17 = vmax.f32 %v199_v15, 0.0 }
  0x8e   : > { %202 = vst [vmem:[%s172_s25] sm:$0xff] %v200_v16 }
  0x8f   : > { %203 = vst [vmem:[%s172_s25 + $0x8] sm:$0xff] %v201_v17 }
  0x90 PF: > { %s13_s12 = sadd.s32 1, %s288_s12  }
  0x91   : > { %p10_p4 = scmp.ge.s32.totalorder %s13_s12, 4  }
  0x93   :  { %12 = sbr.rel (!%p10_p4) target bundleno = 1 (0x1), region = 62 }

</bundles_post_ra>
